<compile_context>
chip_gen: v5e
topology: v5e:2x2
jax: 0.10.0
libtpu: 0.0.40
codegen_flags: <defaults>
</compile_context>

<pallas_src>
import math

import jax
import jax.numpy as jnp
from jax.experimental import pallas as pl
from jax.experimental.pallas import tpu as pltpu

NET_SCALE = 2
NEG_SLOPE = 0.01          # PyTorch nn.LeakyReLU default
LANE = 128                # TPU lane width: pad all feature dims to a multiple of this
SUBLANE = 8
TM_MAX = 256              # batch-tile rows per grid step
COMPUTE_DTYPE = jnp.bfloat16   # MXU input dtype (f32 accumulation)


def _round_up(x, m):
    return ((x + m - 1) // m) * m


def _leaky_relu(h):
    return jnp.where(h > 0, h, NEG_SLOPE * h)


def _layer_dims(in_channels, out_channels):
    return [
        in_channels,
        200 * NET_SCALE, 200 * NET_SCALE,
        100 * NET_SCALE, 100 * NET_SCALE,
        50 * NET_SCALE,
        out_channels,
    ]


def dense_nn_kernel(
    x_ref,
    w1_ref, b1_ref, w2_ref, b2_ref, w3_ref, b3_ref,
    w4_ref, b4_ref, w5_ref, b5_ref, w6_ref, b6_ref,
    o_ref,
):
    """One batch tile of the fused 6-layer MLP.

    Weights/biases stay resident in VMEM (constant index_map); only the x / out
    tiles stream through the grid. Matmuls run on the MXU in bf16 with f32
    accumulation; bias add + LeakyReLU run in f32 on the VPU.
    """
    # Hoist bias reads once (JAX does not CSE the broadcast per layer).
    b1 = b1_ref[...]; b2 = b2_ref[...]; b3 = b3_ref[...]
    b4 = b4_ref[...]; b5 = b5_ref[...]; b6 = b6_ref[...]

    cdt = w1_ref.dtype  # bf16 matmul-input dtype

    def layer(h, w_ref, b, *, act):
        acc = jnp.dot(h, w_ref[...], preferred_element_type=jnp.float32) + b
        return _leaky_relu(acc) if act else acc

    h = x_ref[...]                                     # (TM, Cin_pad), bf16
    h = layer(h, w1_ref, b1, act=True).astype(cdt)
    h = layer(h, w2_ref, b2, act=True).astype(cdt)
    h = layer(h, w3_ref, b3, act=True).astype(cdt)
    h = layer(h, w4_ref, b4, act=True).astype(cdt)
    h = layer(h, w5_ref, b5, act=True).astype(cdt)
    o_ref[...] = layer(h, w6_ref, b6, act=False).astype(o_ref.dtype)


def init_dense_nn_params(key, in_channels, out_channels):
    """PyTorch nn.Linear default init: weight, bias ~ U(-1/sqrt(fan_in), 1/sqrt(fan_in)).
    Weights stored in (in, out) layout (PyTorch weight transposed)."""
    dims = _layer_dims(in_channels, out_channels)
    params = []
    for i in range(6):
        fan_in, fan_out = dims[i], dims[i + 1]
        key, kw, kb = jax.random.split(key, 3)
        bound = 1.0 / math.sqrt(fan_in)
        w = jax.random.uniform(kw, (fan_in, fan_out), jnp.float32, -bound, bound)
        b = jax.random.uniform(kb, (1, fan_out), jnp.float32, -bound, bound)
        params.append((w, b))
    return params


def _pad_params(params):
    """Zero-pad every weight/bias to lane-aligned feature dims; weights -> bf16."""
    flat = []
    for w, b in params:
        fi, fo = w.shape
        fi_p, fo_p = _round_up(fi, LANE), _round_up(fo, LANE)
        wp = jnp.zeros((fi_p, fo_p), COMPUTE_DTYPE).at[:fi, :fo].set(
            w.astype(COMPUTE_DTYPE))
        bp = jnp.zeros((1, fo_p), jnp.float32).at[:, :fo].set(b)
        flat.extend([wp, bp])
    return flat


@jax.jit
def dense_nn_forward(x, params):
    """Flattens leading dims to a batch, pads to TPU-friendly shapes, runs the
    batch-tiled fused Pallas kernel, and slices the result back."""
    orig_shape = x.shape
    in_ch = orig_shape[-1]
    out_ch = params[-1][0].shape[1]

    x2d = x.reshape(-1, in_ch)
    batch = x2d.shape[0]

    in_pad = _round_up(in_ch, LANE)
    out_pad = _round_up(out_ch, LANE)

    # Batch tile: multiple of 8 sublanes, capped at TM_MAX; pad batch so every
    # grid step sees a full in-bounds tile.
    tm = min(TM_MAX, _round_up(batch, SUBLANE))
    batch_pad = _round_up(batch, tm)

    xp = jnp.zeros((batch_pad, in_pad), COMPUTE_DTYPE)
    xp = xp.at[:batch, :in_ch].set(x2d.astype(COMPUTE_DTYPE))

    flat_params = _pad_params(params)

    dims_p = [_round_up(d, LANE) for d in _layer_dims(in_ch, out_ch)]
    flops = 2 * batch_pad * sum(dims_p[i] * dims_p[i + 1] for i in range(6))
    bytes_accessed = (
        xp.size * xp.dtype.itemsize
        + sum(p.size * p.dtype.itemsize for p in flat_params)
        + batch_pad * out_pad * 4
    )

    in_specs = [pl.BlockSpec((tm, in_pad), lambda i: (i, 0))]   # streamed x tile
    for p in flat_params:                                       # resident weights/biases
        in_specs.append(pl.BlockSpec(p.shape, lambda i: (0, 0)))

    out = pl.pallas_call(
        dense_nn_kernel,
        out_shape=jax.ShapeDtypeStruct((batch_pad, out_pad), jnp.float32),
        grid=(batch_pad // tm,),
        in_specs=in_specs,
        out_specs=pl.BlockSpec((tm, out_pad), lambda i: (i, 0)),
        compiler_params=pltpu.CompilerParams(
            dimension_semantics=("parallel",),   # megacore: split batch tiles across TCs
        ),
        cost_estimate=pl.CostEstimate(
            flops=flops, transcendentals=0, bytes_accessed=bytes_accessed),
    )(xp, *flat_params)

    out = out[:batch, :out_ch]
    return out.reshape(*orig_shape[:-1], out_ch)


def dense_nn_reference(x, params):
    """Pure-JAX reference that mimics the kernel's bf16-input / f32-accumulate math."""
    h = x.reshape(-1, x.shape[-1])
    for i, (w, b) in enumerate(params):
        acc = jnp.dot(h.astype(COMPUTE_DTYPE), w.astype(COMPUTE_DTYPE),
                      preferred_element_type=jnp.float32) + b
        h = _leaky_relu(acc) if i < len(params) - 1 else acc
    return h.reshape(*x.shape[:-1], params[-1][0].shape[1])


if __name__ == "__main__":
    in_channels = 16
    out_channels = 4
    batch = 8

    key = jax.random.PRNGKey(0)
    key_x, key_p = jax.random.split(key)

    x = jax.random.normal(key_x, (batch, in_channels), dtype=jnp.float32)
    params = init_dense_nn_params(key_p, in_channels, out_channels)

    y = dense_nn_forward(x, params)
    y = jax.block_until_ready(y)

    y_ref = dense_nn_reference(x, params)
    assert y.shape == (batch, out_channels), y.shape
    assert jnp.allclose(y, y_ref, atol=1e-2, rtol=1e-2), "mismatch vs reference"

    print("KERNEL_OK")
</pallas_src>

<mosaic_0001>
module attributes {stable_mosaic.version = 11 : i64} {
  func.func @dense_nn_kernel(%arg0: i32, %arg1: memref<8x128xbf16, #tpu.memory_space<vmem>>, %arg2: memref<128x512xbf16, #tpu.memory_space<vmem>>, %arg3: memref<1x512xf32, #tpu.memory_space<vmem>>, %arg4: memref<512x512xbf16, #tpu.memory_space<vmem>>, %arg5: memref<1x512xf32, #tpu.memory_space<vmem>>, %arg6: memref<512x256xbf16, #tpu.memory_space<vmem>>, %arg7: memref<1x256xf32, #tpu.memory_space<vmem>>, %arg8: memref<256x256xbf16, #tpu.memory_space<vmem>>, %arg9: memref<1x256xf32, #tpu.memory_space<vmem>>, %arg10: memref<256x128xbf16, #tpu.memory_space<vmem>>, %arg11: memref<1x128xf32, #tpu.memory_space<vmem>>, %arg12: memref<128x128xbf16, #tpu.memory_space<vmem>>, %arg13: memref<1x128xf32, #tpu.memory_space<vmem>>, %arg14: memref<8x128xf32, #tpu.memory_space<vmem>>) attributes {dimension_semantics = [#tpu.dimension_semantics<parallel>], iteration_bounds = array<i64: 1>, scalar_prefetch = 0 : i64, scratch_operands = 0 : i64, tpu.core_type = #tpu.core_type<tc>, window_params = [{transform_indices = @transform_0, window_bounds = array<i64: 8, 128>}, {pipeline_mode = #tpu.pipeline_mode<synchronous>, transform_indices = @transform_1, window_bounds = array<i64: 128, 512>}, {pipeline_mode = #tpu.pipeline_mode<synchronous>, transform_indices = @transform_2, window_bounds = array<i64: 1, 512>}, {pipeline_mode = #tpu.pipeline_mode<synchronous>, transform_indices = @transform_3, window_bounds = array<i64: 512, 512>}, {pipeline_mode = #tpu.pipeline_mode<synchronous>, transform_indices = @transform_4, window_bounds = array<i64: 1, 512>}, {pipeline_mode = #tpu.pipeline_mode<synchronous>, transform_indices = @transform_5, window_bounds = array<i64: 512, 256>}, {pipeline_mode = #tpu.pipeline_mode<synchronous>, transform_indices = @transform_6, window_bounds = array<i64: 1, 256>}, {pipeline_mode = #tpu.pipeline_mode<synchronous>, transform_indices = @transform_7, window_bounds = array<i64: 256, 256>}, {pipeline_mode = #tpu.pipeline_mode<synchronous>, transform_indices = @transform_8, window_bounds = array<i64: 1, 256>}, {pipeline_mode = #tpu.pipeline_mode<synchronous>, transform_indices = @transform_9, window_bounds = array<i64: 256, 128>}, {pipeline_mode = #tpu.pipeline_mode<synchronous>, transform_indices = @transform_10, window_bounds = array<i64: 1, 128>}, {pipeline_mode = #tpu.pipeline_mode<synchronous>, transform_indices = @transform_11, window_bounds = array<i64: 128, 128>}, {pipeline_mode = #tpu.pipeline_mode<synchronous>, transform_indices = @transform_12, window_bounds = array<i64: 1, 128>}, {transform_indices = @transform_13, window_bounds = array<i64: 8, 128>}]} {
    %c0 = arith.constant 0 : index
    %c0_0 = arith.constant 0 : index
    %0 = vector.load %arg3[%c0, %c0_0] : memref<1x512xf32, #tpu.memory_space<vmem>>, vector<1x512xf32>
    %c0_1 = arith.constant 0 : index
    %c0_2 = arith.constant 0 : index
    %1 = vector.load %arg5[%c0_1, %c0_2] : memref<1x512xf32, #tpu.memory_space<vmem>>, vector<1x512xf32>
    %c0_3 = arith.constant 0 : index
    %c0_4 = arith.constant 0 : index
    %2 = vector.load %arg7[%c0_3, %c0_4] : memref<1x256xf32, #tpu.memory_space<vmem>>, vector<1x256xf32>
    %c0_5 = arith.constant 0 : index
    %c0_6 = arith.constant 0 : index
    %3 = vector.load %arg9[%c0_5, %c0_6] : memref<1x256xf32, #tpu.memory_space<vmem>>, vector<1x256xf32>
    %c0_7 = arith.constant 0 : index
    %c0_8 = arith.constant 0 : index
    %4 = vector.load %arg11[%c0_7, %c0_8] : memref<1x128xf32, #tpu.memory_space<vmem>>, vector<1x128xf32>
    %c0_9 = arith.constant 0 : index
    %c0_10 = arith.constant 0 : index
    %5 = vector.load %arg13[%c0_9, %c0_10] : memref<1x128xf32, #tpu.memory_space<vmem>>, vector<1x128xf32>
    %c0_11 = arith.constant 0 : index
    %c0_12 = arith.constant 0 : index
    %6 = vector.load %arg1[%c0_11, %c0_12] : memref<8x128xbf16, #tpu.memory_space<vmem>>, vector<8x128xbf16>
    %c0_13 = arith.constant 0 : index
    %c0_14 = arith.constant 0 : index
    %7 = vector.load %arg2[%c0_13, %c0_14] : memref<128x512xbf16, #tpu.memory_space<vmem>>, vector<128x512xbf16>
    %cst = arith.constant dense<0.000000e+00> : vector<8x512xf32>
    %8 = tpu.matmul %6, %7, %cst {dimension_numbers = #tpu.dot_dimension_numbers<[1], [0], [0], [1], [0, 0, 1, 1], [], []>} : vector<8x128xbf16>, vector<128x512xbf16>, vector<8x512xf32> -> vector<8x512xf32>
    %9 = vector.broadcast %0 : vector<1x512xf32> to vector<8x512xf32>
    %10 = arith.addf %8, %9 : vector<8x512xf32>
    %cst_15 = arith.constant 0.000000e+00 : f32
    %11 = vector.broadcast %cst_15 : f32 to vector<8x512xf32>
    %12 = arith.cmpf ogt, %10, %11 : vector<8x512xf32>
    %cst_16 = arith.constant 0.00999999977 : f32
    %13 = vector.broadcast %cst_16 : f32 to vector<8x512xf32>
    %14 = arith.mulf %13, %10 : vector<8x512xf32>
    %15 = arith.select %12, %10, %14 : vector<8x512xi1>, vector<8x512xf32>
    %16 = arith.truncf %15 : vector<8x512xf32> to vector<8x512xbf16>
    %c0_17 = arith.constant 0 : index
    %c0_18 = arith.constant 0 : index
    %17 = vector.load %arg4[%c0_17, %c0_18] : memref<512x512xbf16, #tpu.memory_space<vmem>>, vector<512x512xbf16>
    %cst_19 = arith.constant dense<0.000000e+00> : vector<8x512xf32>
    %18 = tpu.matmul %16, %17, %cst_19 {dimension_numbers = #tpu.dot_dimension_numbers<[1], [0], [0], [1], [0, 0, 1, 1], [], []>} : vector<8x512xbf16>, vector<512x512xbf16>, vector<8x512xf32> -> vector<8x512xf32>
    %19 = vector.broadcast %1 : vector<1x512xf32> to vector<8x512xf32>
    %20 = arith.addf %18, %19 : vector<8x512xf32>
    %cst_20 = arith.constant 0.000000e+00 : f32
    %21 = vector.broadcast %cst_20 : f32 to vector<8x512xf32>
    %22 = arith.cmpf ogt, %20, %21 : vector<8x512xf32>
    %cst_21 = arith.constant 0.00999999977 : f32
    %23 = vector.broadcast %cst_21 : f32 to vector<8x512xf32>
    %24 = arith.mulf %23, %20 : vector<8x512xf32>
    %25 = arith.select %22, %20, %24 : vector<8x512xi1>, vector<8x512xf32>
    %26 = arith.truncf %25 : vector<8x512xf32> to vector<8x512xbf16>
    %c0_22 = arith.constant 0 : index
    %c0_23 = arith.constant 0 : index
    %27 = vector.load %arg6[%c0_22, %c0_23] : memref<512x256xbf16, #tpu.memory_space<vmem>>, vector<512x256xbf16>
    %cst_24 = arith.constant dense<0.000000e+00> : vector<8x256xf32>
    %28 = tpu.matmul %26, %27, %cst_24 {dimension_numbers = #tpu.dot_dimension_numbers<[1], [0], [0], [1], [0, 0, 1, 1], [], []>} : vector<8x512xbf16>, vector<512x256xbf16>, vector<8x256xf32> -> vector<8x256xf32>
    %29 = vector.broadcast %2 : vector<1x256xf32> to vector<8x256xf32>
    %30 = arith.addf %28, %29 : vector<8x256xf32>
    %cst_25 = arith.constant 0.000000e+00 : f32
    %31 = vector.broadcast %cst_25 : f32 to vector<8x256xf32>
    %32 = arith.cmpf ogt, %30, %31 : vector<8x256xf32>
    %cst_26 = arith.constant 0.00999999977 : f32
    %33 = vector.broadcast %cst_26 : f32 to vector<8x256xf32>
    %34 = arith.mulf %33, %30 : vector<8x256xf32>
    %35 = arith.select %32, %30, %34 : vector<8x256xi1>, vector<8x256xf32>
    %36 = arith.truncf %35 : vector<8x256xf32> to vector<8x256xbf16>
    %c0_27 = arith.constant 0 : index
    %c0_28 = arith.constant 0 : index
    %37 = vector.load %arg8[%c0_27, %c0_28] : memref<256x256xbf16, #tpu.memory_space<vmem>>, vector<256x256xbf16>
    %cst_29 = arith.constant dense<0.000000e+00> : vector<8x256xf32>
    %38 = tpu.matmul %36, %37, %cst_29 {dimension_numbers = #tpu.dot_dimension_numbers<[1], [0], [0], [1], [0, 0, 1, 1], [], []>} : vector<8x256xbf16>, vector<256x256xbf16>, vector<8x256xf32> -> vector<8x256xf32>
    %39 = vector.broadcast %3 : vector<1x256xf32> to vector<8x256xf32>
    %40 = arith.addf %38, %39 : vector<8x256xf32>
    %cst_30 = arith.constant 0.000000e+00 : f32
    %41 = vector.broadcast %cst_30 : f32 to vector<8x256xf32>
    %42 = arith.cmpf ogt, %40, %41 : vector<8x256xf32>
    %cst_31 = arith.constant 0.00999999977 : f32
    %43 = vector.broadcast %cst_31 : f32 to vector<8x256xf32>
    %44 = arith.mulf %43, %40 : vector<8x256xf32>
    %45 = arith.select %42, %40, %44 : vector<8x256xi1>, vector<8x256xf32>
    %46 = arith.truncf %45 : vector<8x256xf32> to vector<8x256xbf16>
    %c0_32 = arith.constant 0 : index
    %c0_33 = arith.constant 0 : index
    %47 = vector.load %arg10[%c0_32, %c0_33] : memref<256x128xbf16, #tpu.memory_space<vmem>>, vector<256x128xbf16>
    %cst_34 = arith.constant dense<0.000000e+00> : vector<8x128xf32>
    %48 = tpu.matmul %46, %47, %cst_34 {dimension_numbers = #tpu.dot_dimension_numbers<[1], [0], [0], [1], [0, 0, 1, 1], [], []>} : vector<8x256xbf16>, vector<256x128xbf16>, vector<8x128xf32> -> vector<8x128xf32>
    %49 = vector.broadcast %4 : vector<1x128xf32> to vector<8x128xf32>
    %50 = arith.addf %48, %49 : vector<8x128xf32>
    %cst_35 = arith.constant 0.000000e+00 : f32
    %51 = vector.broadcast %cst_35 : f32 to vector<8x128xf32>
    %52 = arith.cmpf ogt, %50, %51 : vector<8x128xf32>
    %cst_36 = arith.constant 0.00999999977 : f32
    %53 = vector.broadcast %cst_36 : f32 to vector<8x128xf32>
    %54 = arith.mulf %53, %50 : vector<8x128xf32>
    %55 = arith.select %52, %50, %54 : vector<8x128xi1>, vector<8x128xf32>
    %56 = arith.truncf %55 : vector<8x128xf32> to vector<8x128xbf16>
    %c0_37 = arith.constant 0 : index
    %c0_38 = arith.constant 0 : index
    %57 = vector.load %arg12[%c0_37, %c0_38] : memref<128x128xbf16, #tpu.memory_space<vmem>>, vector<128x128xbf16>
    %cst_39 = arith.constant dense<0.000000e+00> : vector<8x128xf32>
    %58 = tpu.matmul %56, %57, %cst_39 {dimension_numbers = #tpu.dot_dimension_numbers<[1], [0], [0], [1], [0, 0, 1, 1], [], []>} : vector<8x128xbf16>, vector<128x128xbf16>, vector<8x128xf32> -> vector<8x128xf32>
    %59 = vector.broadcast %5 : vector<1x128xf32> to vector<8x128xf32>
    %60 = arith.addf %58, %59 : vector<8x128xf32>
    %c0_40 = arith.constant 0 : index
    %c0_41 = arith.constant 0 : index
    %61 = vector.load %arg14[%c0_40, %c0_41] : memref<8x128xf32, #tpu.memory_space<vmem>>, vector<8x128xf32>
    tpu.vector_store %arg14[%c0_40, %c0_41], %60 {strides = array<i32>} : memref<8x128xf32, #tpu.memory_space<vmem>>, vector<8x128xf32>,
    return
  }
  func.func @transform_0(%arg0: i32) -> (i32, i32) {
    %c0_i32 = arith.constant 0 : i32
    %c0_i32_0 = arith.constant 0 : i32
    return %arg0, %c0_i32 : i32, i32
  }
  func.func @transform_1(%arg0: i32) -> (i32, i32) {
    %c0_i32 = arith.constant 0 : i32
    %c0_i32_0 = arith.constant 0 : i32
    %c0_i32_1 = arith.constant 0 : i32
    return %c0_i32, %c0_i32_0 : i32, i32
  }
  func.func @transform_2(%arg0: i32) -> (i32, i32) {
    %c0_i32 = arith.constant 0 : i32
    %c0_i32_0 = arith.constant 0 : i32
    %c0_i32_1 = arith.constant 0 : i32
    return %c0_i32, %c0_i32_0 : i32, i32
  }
  func.func @transform_3(%arg0: i32) -> (i32, i32) {
    %c0_i32 = arith.constant 0 : i32
    %c0_i32_0 = arith.constant 0 : i32
    %c0_i32_1 = arith.constant 0 : i32
    return %c0_i32, %c0_i32_0 : i32, i32
  }
  func.func @transform_4(%arg0: i32) -> (i32, i32) {
    %c0_i32 = arith.constant 0 : i32
    %c0_i32_0 = arith.constant 0 : i32
    %c0_i32_1 = arith.constant 0 : i32
    return %c0_i32, %c0_i32_0 : i32, i32
  }
  func.func @transform_5(%arg0: i32) -> (i32, i32) {
    %c0_i32 = arith.constant 0 : i32
    %c0_i32_0 = arith.constant 0 : i32
    %c0_i32_1 = arith.constant 0 : i32
    return %c0_i32, %c0_i32_0 : i32, i32
  }
  func.func @transform_6(%arg0: i32) -> (i32, i32) {
    %c0_i32 = arith.constant 0 : i32
    %c0_i32_0 = arith.constant 0 : i32
    %c0_i32_1 = arith.constant 0 : i32
    return %c0_i32, %c0_i32_0 : i32, i32
  }
  func.func @transform_7(%arg0: i32) -> (i32, i32) {
    %c0_i32 = arith.constant 0 : i32
    %c0_i32_0 = arith.constant 0 : i32
    %c0_i32_1 = arith.constant 0 : i32
    return %c0_i32, %c0_i32_0 : i32, i32
  }
  func.func @transform_8(%arg0: i32) -> (i32, i32) {
    %c0_i32 = arith.constant 0 : i32
    %c0_i32_0 = arith.constant 0 : i32
    %c0_i32_1 = arith.constant 0 : i32
    return %c0_i32, %c0_i32_0 : i32, i32
  }
  func.func @transform_9(%arg0: i32) -> (i32, i32) {
    %c0_i32 = arith.constant 0 : i32
    %c0_i32_0 = arith.constant 0 : i32
    %c0_i32_1 = arith.constant 0 : i32
    return %c0_i32, %c0_i32_0 : i32, i32
  }
  func.func @transform_10(%arg0: i32) -> (i32, i32) {
    %c0_i32 = arith.constant 0 : i32
    %c0_i32_0 = arith.constant 0 : i32
    %c0_i32_1 = arith.constant 0 : i32
    return %c0_i32, %c0_i32_0 : i32, i32
  }
  func.func @transform_11(%arg0: i32) -> (i32, i32) {
    %c0_i32 = arith.constant 0 : i32
    %c0_i32_0 = arith.constant 0 : i32
    %c0_i32_1 = arith.constant 0 : i32
    return %c0_i32, %c0_i32_0 : i32, i32
  }
  func.func @transform_12(%arg0: i32) -> (i32, i32) {
    %c0_i32 = arith.constant 0 : i32
    %c0_i32_0 = arith.constant 0 : i32
    %c0_i32_1 = arith.constant 0 : i32
    return %c0_i32, %c0_i32_0 : i32, i32
  }
  func.func @transform_13(%arg0: i32) -> (i32, i32) {
    %c0_i32 = arith.constant 0 : i32
    %c0_i32_0 = arith.constant 0 : i32
    return %arg0, %c0_i32 : i32, i32
  }
}

</mosaic_0001>

<bundles_post_ra>
// kernel: dense_nn_forward.1
= control target key start
LH: loop header
LB: loop body
LE: loop exit
PB: predicated region body
PF: predicated region fallthrough
CT: control target
= control target key end

     0   :  { %s5474_s1 = inlined_call_operand.vmem [shape: bf16[128,512], index: 1, kind: input, shape index: {}]   ;;  %s5475_s3 = inlined_call_operand.vmem [shape: bf16[512,512], index: 3, kind: input, shape index: {}]   ;;  %s5476_s0 = inlined_call_operand.vmem [shape: bf16[8,128], index: 0, kind: input, shape index: {}]   ;;  %s5477_s2 = inlined_call_operand.vmem [shape: f32[1,512], index: 2, kind: input, shape index: {}]   ;;  %s5478_s5 = inlined_call_operand.vmem [shape: bf16[512,256], index: 5, kind: input, shape index: {}]   ;;  %s5479_s4 = inlined_call_operand.vmem [shape: f32[1,512], index: 4, kind: input, shape index: {}]   ;;  %s5480_s7 = inlined_call_operand.vmem [shape: bf16[256,256], index: 7, kind: input, shape index: {}]   ;;  %s5481_s6 = inlined_call_operand.vmem [shape: f32[1,256], index: 6, kind: input, shape index: {}]   ;;  %s5482_s9 = inlined_call_operand.vmem [shape: bf16[256,128], index: 9, kind: input, shape index: {}]   ;;  %s5483_s10 = inlined_call_operand.vmem [shape: f32[1,128], index: 10, kind: input, shape index: {}]   ;;  %s5484_s11 = inlined_call_operand.vmem [shape: bf16[128,128], index: 11, kind: input, shape index: {}]   ;;  %s5485_s8 = inlined_call_operand.vmem [shape: f32[1,256], index: 8, kind: input, shape index: {}]   ;;  %s5486_s12 = inlined_call_operand.vmem [shape: f32[1,128], index: 12, kind: input, shape index: {}]   ;;  %s5487_s13 = inlined_call_operand.vmem [shape: f32[8,128], index: 13, kind: output, shape index: {}]  }
   0x1   :  { %v2439_v0 = vld [vmem:[%s5474_s1 + $0xe0] sm:$0xf]  ;;  %v3475_v1 = vld [vmem:[%s5474_s1 + $0xec] sm:$0xf0]  ;;  %v3473_v2 = vld [vmem:[%s5474_s1 + $0xe4] sm:$0xf] }
   0x2   :  { %v2440_v3 = vor.u32 %v3475_v1, %v2439_v0  ;;  %v2441_v4 = vld [vmem:[%s5474_s1 + $0xf0] sm:$0xf0]  ;;  %v2447_v5 = vld [vmem:[%s5474_s1 + $0xe8] sm:$0xf]  ;;  %v3476_v6 = vld [vmem:[%s5474_s1 + $0xf4] sm:$0xf0] }
   0x3   :  { %v2444_v7 = vor.u32 %v3473_v2, %v2441_v4  ;;  %v2448_v8 = vor.u32 %v3476_v6, %v2447_v5  ;;  %v3474_v9 = vld [vmem:[%s5474_s1 + $0xec] sm:$0xf]  ;;  %v2449_v10 = vld [vmem:[%s5474_s1 + $0xf8] sm:$0xf0]  ;;  %v2423_v11 = vld [vmem:[%s5474_s1 + $0xc0] sm:$0xf] }
   0x4   :  { %252 = vmatpush.bf16.msra.mxu0 %v2440_v3  ;;  %v2452_v12 = vor.u32 %v3474_v9, %v2449_v10  ;;  %v3471_v13 = vld [vmem:[%s5474_s1 + $0xcc] sm:$0xf0]  ;;  %v3469_v14 = vld [vmem:[%s5474_s1 + $0xc4] sm:$0xf]  ;;  %v2425_v15 = vld [vmem:[%s5474_s1 + $0xd0] sm:$0xf0] }
   0x5   :  { %265 = vmatpush.bf16.msra.mxu1 %v2444_v7  ;;  %278 = vmatpush.bf16.msra.mxu2 %v2448_v8  ;;  %v2424_v16 = vor.u32 %v3471_v13, %v2423_v11  ;;  %v2428_v17 = vor.u32 %v3469_v14, %v2425_v15  ;;  %v2431_v18 = vld [vmem:[%s5474_s1 + $0xc8] sm:$0xf]  ;;  %v3472_v19 = vld [vmem:[%s5474_s1 + $0xd4] sm:$0xf0]  ;;  %v3470_v20 = vld [vmem:[%s5474_s1 + $0xcc] sm:$0xf] }
   0x6   :  { %291 = vmatpush.bf16.msra.mxu3 %v2452_v12  ;;  %v2432_v21 = vor.u32 %v3472_v19, %v2431_v18  ;;  %v2433_v22 = vld [vmem:[%s5474_s1 + $0xd8] sm:$0xf0]  ;;  %v2407_v23 = vld [vmem:[%s5474_s1 + $0xa0] sm:$0xf]  ;;  %v3467_v24 = vld [vmem:[%s5474_s1 + $0xac] sm:$0xf0] }
   0x7   :  { %v2436_v25 = vor.u32 %v3470_v20, %v2433_v22  ;;  %v3465_v26 = vld [vmem:[%s5474_s1 + $0xa4] sm:$0xf]  ;;  %v2409_v27 = vld [vmem:[%s5474_s1 + $0xb0] sm:$0xf0]  ;;  %v2415_v28 = vld [vmem:[%s5474_s1 + $0xa8] sm:$0xf]  ;;  %v2408_v29 = vor.u32 %v3467_v24, %v2407_v23 }
   0x8   :  { %253 = vmatpush.bf16.msra.mxu0 %v2424_v16  ;;  %v3468_v30 = vld [vmem:[%s5474_s1 + $0xb4] sm:$0xf0]  ;;  %v3466_v31 = vld [vmem:[%s5474_s1 + $0xac] sm:$0xf]  ;;  %v2417_v32 = vld [vmem:[%s5474_s1 + $0xb8] sm:$0xf0]  ;;  %v2412_v33 = vor.u32 %v3465_v26, %v2409_v27 }
   0x9   :  { %266 = vmatpush.bf16.msra.mxu1 %v2428_v17  ;;  %279 = vmatpush.bf16.msra.mxu2 %v2432_v21  ;;  %v2416_v34 = vor.u32 %v3468_v30, %v2415_v28  ;;  %v2391_v35 = vld [vmem:[%s5474_s1 + $0x80] sm:$0xf]  ;;  %v3463_v36 = vld [vmem:[%s5474_s1 + $0x8c] sm:$0xf0]  ;;  %v3461_v37 = vld [vmem:[%s5474_s1 + $0x84] sm:$0xf]  ;;  %v2420_v38 = vor.u32 %v3466_v31, %v2417_v32 }
   0xa   :  { %292 = vmatpush.bf16.msra.mxu3 %v2436_v25  ;;  %v2393_v39 = vld [vmem:[%s5474_s1 + $0x90] sm:$0xf0]  ;;  %v2399_v40 = vld [vmem:[%s5474_s1 + $0x88] sm:$0xf]  ;;  %v3464_v41 = vld [vmem:[%s5474_s1 + $0x94] sm:$0xf0]  ;;  %v2392_v44 = vor.u32 %v3463_v36, %v2391_v35 }
   0xb   :  { %v3462_v42 = vld [vmem:[%s5474_s1 + $0x8c] sm:$0xf]  ;;  %v2401_v43 = vld [vmem:[%s5474_s1 + $0x98] sm:$0xf0]  ;;  %v2396_v45 = vor.u32 %v3461_v37, %v2393_v39  ;;  %v2400_v46 = vor.u32 %v3464_v41, %v2399_v40  ;;  %v2375_v47 = vld [vmem:[%s5474_s1 + $0x60] sm:$0xf] }
   0xc   :  { %254 = vmatpush.bf16.msra.mxu0 %v2408_v29  ;;  %v3459_v48 = vld [vmem:[%s5474_s1 + $0x6c] sm:$0xf0]  ;;  %v3457_v49 = vld [vmem:[%s5474_s1 + $0x64] sm:$0xf]  ;;  %v2404_v50 = vor.u32 %v3462_v42, %v2401_v43  ;;  %v2377_v51 = vld [vmem:[%s5474_s1 + $0x70] sm:$0xf0] }
   0xd   :  { %267 = vmatpush.bf16.msra.mxu1 %v2412_v33  ;;  %280 = vmatpush.bf16.msra.mxu2 %v2416_v34  ;;  %v2383_v52 = vld [vmem:[%s5474_s1 + $0x68] sm:$0xf]  ;;  %v3460_v53 = vld [vmem:[%s5474_s1 + $0x74] sm:$0xf0]  ;;  %v3458_v54 = vld [vmem:[%s5474_s1 + $0x6c] sm:$0xf]  ;;  %v2376_v56 = vor.u32 %v3459_v48, %v2375_v47  ;;  %v2380_v57 = vor.u32 %v3457_v49, %v2377_v51 }
   0xe   :  { %293 = vmatpush.bf16.msra.mxu3 %v2420_v38  ;;  %v2385_v55 = vld [vmem:[%s5474_s1 + $0x78] sm:$0xf0]  ;;  %v2384_v58 = vor.u32 %v3460_v53, %v2383_v52  ;;  %v2359_v59 = vld [vmem:[%s5474_s1 + $0x40] sm:$0xf]  ;;  %v3455_v60 = vld [vmem:[%s5474_s1 + $0x4c] sm:$0xf0] }
   0xf   :  { %v3453_v61 = vld [vmem:[%s5474_s1 + $0x44] sm:$0xf]  ;;  %v2388_v62 = vor.u32 %v3458_v54, %v2385_v55  ;;  %v2361_v63 = vld [vmem:[%s5474_s1 + $0x50] sm:$0xf0]  ;;  %v2367_v0 = vld [vmem:[%s5474_s1 + $0x48] sm:$0xf]  ;;  %v2360_v4 = vor.u32 %v3455_v60, %v2359_v59 }
  0x10   :  { %255 = vmatpush.bf16.msra.mxu0 %v2392_v44  ;;  %v3456_v1 = vld [vmem:[%s5474_s1 + $0x54] sm:$0xf0]  ;;  %v3454_v2 = vld [vmem:[%s5474_s1 + $0x4c] sm:$0xf]  ;;  %v2369_v3 = vld [vmem:[%s5474_s1 + $0x58] sm:$0xf0]  ;;  %v2364_v5 = vor.u32 %v3453_v61, %v2361_v63 }
  0x11   :  { %268 = vmatpush.bf16.msra.mxu1 %v2396_v45  ;;  %281 = vmatpush.bf16.msra.mxu2 %v2400_v46  ;;  %v2368_v6 = vor.u32 %v3456_v1, %v2367_v0  ;;  %v2343_v7 = vld [vmem:[%s5474_s1 + $0x20] sm:$0xf]  ;;  %v3451_v8 = vld [vmem:[%s5474_s1 + $0x2c] sm:$0xf0]  ;;  %v3449_v9 = vld [vmem:[%s5474_s1 + $0x24] sm:$0xf]  ;;  %v2372_v10 = vor.u32 %v3454_v2, %v2369_v3 }
  0x12   :  { %294 = vmatpush.bf16.msra.mxu3 %v2404_v50  ;;  %v2345_v11 = vld [vmem:[%s5474_s1 + $0x30] sm:$0xf0]  ;;  %v2351_v12 = vld [vmem:[%s5474_s1 + $0x28] sm:$0xf]  ;;  %v3452_v13 = vld [vmem:[%s5474_s1 + $0x34] sm:$0xf0]  ;;  %v2344_v16 = vor.u32 %v3451_v8, %v2343_v7 }
  0x13   :  { %v3450_v14 = vld [vmem:[%s5474_s1 + $0x2c] sm:$0xf]  ;;  %v2353_v15 = vld [vmem:[%s5474_s1 + $0x38] sm:$0xf0]  ;;  %v2327_v17 = vld [vmem:[%s5474_s1] sm:$0xf]  ;;  %v2348_v18 = vor.u32 %v3449_v9, %v2345_v11  ;;  %v2352_v19 = vor.u32 %v3452_v13, %v2351_v12 }
  0x14   :  { %256 = vmatpush.bf16.msra.mxu0 %v2376_v56  ;;  %v3447_v20 = vld [vmem:[%s5474_s1 + $0xc] sm:$0xf0]  ;;  %v3445_v21 = vld [vmem:[%s5474_s1 + $0x4] sm:$0xf]  ;;  %v2329_v22 = vld [vmem:[%s5474_s1 + $0x10] sm:$0xf0]  ;;  %v2356_v23 = vor.u32 %v3450_v14, %v2353_v15 }
  0x15   :  { %269 = vmatpush.bf16.msra.mxu1 %v2380_v57  ;;  %282 = vmatpush.bf16.msra.mxu2 %v2384_v58  ;;  %v2335_v24 = vld [vmem:[%s5474_s1 + $0x8] sm:$0xf]  ;;  %v3448_v25 = vld [vmem:[%s5474_s1 + $0x14] sm:$0xf0]  ;;  %v3446_v26 = vld [vmem:[%s5474_s1 + $0xc] sm:$0xf]  ;;  %v2328_v30 = vor.u32 %v3447_v20, %v2327_v17  ;;  %v2332_v33 = vor.u32 %v3445_v21, %v2329_v22 }
  0x16   :  { %295 = vmatpush.bf16.msra.mxu3 %v2388_v62  ;;  %v2337_v27 = vld [vmem:[%s5474_s1 + $0x18] sm:$0xf0]  ;;  %v2567_v28 = vld [vmem:[%s5475_s3 + $0xe0] sm:$0xf]  ;;  %v3507_v29 = vld [vmem:[%s5475_s3 + $0xec] sm:$0xf0]  ;;  %v2336_v34 = vor.u32 %v3448_v25, %v2335_v24 }
  0x17   :  { %v2695_v31 = vld [vmem:[%s5475_s3 + $0x1e0] sm:$0xf]  ;;  %v3539_v32 = vld [vmem:[%s5475_s3 + $0x1ec] sm:$0xf0]  ;;  %v2340_v35 = vor.u32 %v3446_v26, %v2337_v27  ;;  %v2568_v36 = vor.u32 %v3507_v29, %v2567_v28 }
  0x18   :  { %257 = vmatpush.bf16.msra.mxu0 %v2360_v4  ;;  %v2551_v37 = vld [vmem:[%s5475_s3 + $0xc0] sm:$0xf]  ;;  %v3571_v39 = vld [vmem:[%s5475_s3 + $0x2ec] sm:$0xf0]  ;;  %v2696_v40 = vor.u32 %v3539_v32, %v2695_v31 }
  0x19   :  { %270 = vmatpush.bf16.msra.mxu1 %v2364_v5  ;;  %283 = vmatpush.bf16.msra.mxu2 %v2368_v6  ;;  %v2823_v38 = vld [vmem:[%s5475_s3 + $0x2e0] sm:$0xf]  ;;  %v3503_v41 = vld [vmem:[%s5475_s3 + $0xcc] sm:$0xf0] }
  0x1a   :  { %296 = vmatpush.bf16.msra.mxu3 %v2372_v10  ;;  %v2951_v42 = vld [vmem:[%s5475_s3 + $0x3e0] sm:$0xf]  ;;  %v3603_v43 = vld [vmem:[%s5475_s3 + $0x3ec] sm:$0xf0]  ;;  %v2824_v47 = vor.u32 %v3571_v39, %v2823_v38  ;;  %v2552_v48 = vor.u32 %v3503_v41, %v2551_v37 }
  0x1b   :  { %v50_v44 = vld [vmem:[%s5476_s0] sm:$0xf]  ;;  %v3535_v46 = vld [vmem:[%s5475_s3 + $0x1cc] sm:$0xf0]  ;;  %v2952_v49 = vor.u32 %v3603_v43, %v2951_v42 }
  0x1c   :  { %258 = vmatpush.bf16.msra.mxu0 %v2344_v16  ;;  %v2679_v45 = vld [vmem:[%s5475_s3 + $0x1c0] sm:$0xf]  ;;  %v3567_v52 = vld [vmem:[%s5475_s3 + $0x2cc] sm:$0xf0] }
  0x1d   :  { %271 = vmatpush.bf16.msra.mxu1 %v2348_v18  ;;  %284 = vmatpush.bf16.msra.mxu2 %v2352_v19  ;;  %v2535_v50 = vld [vmem:[%s5475_s3 + $0xa0] sm:$0xf]  ;;  %v2680_v53 = vor.u32 %v3535_v46, %v2679_v45  ;;  %v3499_v54 = vld [vmem:[%s5475_s3 + $0xac] sm:$0xf0] }
  0x1e   :  { %297 = vmatpush.bf16.msra.mxu3 %v2356_v23  ;;  %v2807_v51 = vld [vmem:[%s5475_s3 + $0x2c0] sm:$0xf]  ;;  %v3599_v56 = vld [vmem:[%s5475_s3 + $0x3cc] sm:$0xf0]  ;;  %v2536_v60 = vor.u32 %v3499_v54, %v2535_v50 }
  0x1f   :  { %v2935_v55 = vld [vmem:[%s5475_s3 + $0x3c0] sm:$0xf]  ;;  %v3531_v58 = vld [vmem:[%s5475_s3 + $0x1ac] sm:$0xf0]  ;;  %v2808_v59 = vor.u32 %v3567_v52, %v2807_v51 }
  0x20   :  { %259 = vmatpush.bf16.msra.mxu0 %v2328_v30  ;;  %v2663_v57 = vld [vmem:[%s5475_s3 + $0x1a0] sm:$0xf]  ;;  %v2936_v61 = vor.u32 %v3599_v56, %v2935_v55  ;;  %v3563_v0 = vld [vmem:[%s5475_s3 + $0x2ac] sm:$0xf0]  ;;  %v3505_v55 = vld [vmem:[%s5475_s3 + $0xe4] sm:$0xf] }
  0x21   :  { %272 = vmatpush.bf16.msra.mxu1 %v2332_v33  ;;  %285 = vmatpush.bf16.msra.mxu2 %v2336_v34  ;;  %v2519_v62 = vld [vmem:[%s5475_s3 + $0x80] sm:$0xf]  ;;  %v2664_v1 = vor.u32 %v3531_v58, %v2663_v57  ;;  %v3495_v2 = vld [vmem:[%s5475_s3 + $0x8c] sm:$0xf0]  ;;  %v2569_v56 = vld [vmem:[%s5475_s3 + $0xf0] sm:$0xf0] }
  0x22   :  { %298 = vmatpush.bf16.msra.mxu3 %v2340_v35  ;;  %v2791_v63 = vld [vmem:[%s5475_s3 + $0x2a0] sm:$0xf]  ;;  %v3595_v4 = vld [vmem:[%s5475_s3 + $0x3ac] sm:$0xf0]  ;;  %v2520_v8 = vor.u32 %v3495_v2, %v2519_v62  ;;  %v3537_v57 = vld [vmem:[%s5475_s3 + $0x1e4] sm:$0xf] }
  0x23   :  { %260 = vmatmul.bf16.vlgmr.msra.gmra.mxu0 %v50_v44  ;;  %v2919_v3 = vld [vmem:[%s5475_s3 + $0x3a0] sm:$0xf]  ;;  %v3527_v6 = vld [vmem:[%s5475_s3 + $0x18c] sm:$0xf0]  ;;  %v2792_v7 = vor.u32 %v3563_v0, %v2791_v63  ;;  %v2697_v58 = vld [vmem:[%s5475_s3 + $0x1f0] sm:$0xf0] }
  0x24   :  { %1097 = vmatpush.bf16.msrb.mxu0 %v2568_v36  ;;  %273 = vmatmul.bf16.vlgmr.msra.gmra.mxu1 %v50_v44  ;;  %v2647_v5 = vld [vmem:[%s5475_s3 + $0x180] sm:$0xf]  ;;  %v2920_v9 = vor.u32 %v3595_v4, %v2919_v3  ;;  %v3559_v12 = vld [vmem:[%s5475_s3 + $0x28c] sm:$0xf0]  ;;  %v3501_v62 = vld [vmem:[%s5475_s3 + $0xc4] sm:$0xf]  ;;  %v2572_v3 = vor.u32 %v3505_v55, %v2569_v56 }
  0x25   :  { %1110 = vmatpush.bf16.msrb.mxu1 %v2696_v40  ;;  %286 = vmatmul.bf16.vlgmr.msra.gmra.mxu2 %v50_v44  ;;  %v2503_v10 = vld [vmem:[%s5475_s3 + $0x60] sm:$0xf]  ;;  %v2648_v13 = vor.u32 %v3527_v6, %v2647_v5  ;;  %v3491_v14 = vld [vmem:[%s5475_s3 + $0x6c] sm:$0xf0]  ;;  %v3569_v5 = vld [vmem:[%s5475_s3 + $0x2e4] sm:$0xf] }
  0x26   :  { %299 = vmatmul.bf16.vlgmr.msra.gmra.mxu3 %v50_v44  ;;  %1123 = vmatpush.bf16.msrb.mxu2 %v2824_v47  ;;  %v2775_v11 = vld [vmem:[%s5475_s3 + $0x280] sm:$0xf]  ;;  %v3591_v16 = vld [vmem:[%s5475_s3 + $0x38c] sm:$0xf0]  ;;  %v2504_v20 = vor.u32 %v3491_v14, %v2503_v10  ;;  %v2825_v6 = vld [vmem:[%s5475_s3 + $0x2f0] sm:$0xf0] }
  0x27   :  { %1136 = vmatpush.bf16.msrb.mxu3 %v2952_v49  ;;  %v2903_v15 = vld [vmem:[%s5475_s3 + $0x380] sm:$0xf]  ;;  %v3523_v18 = vld [vmem:[%s5475_s3 + $0x16c] sm:$0xf0]  ;;  %v2776_v19 = vor.u32 %v3559_v12, %v2775_v11  ;;  %v2953_v10 = vld [vmem:[%s5475_s3 + $0x3f0] sm:$0xf0] }
  0x28   :  { %1098 = vmatpush.bf16.msrb.mxu0 %v2552_v48  ;;  %v2631_v17 = vld [vmem:[%s5475_s3 + $0x160] sm:$0xf]  ;;  %v2904_v21 = vor.u32 %v3591_v16, %v2903_v15  ;;  %v3555_v24 = vld [vmem:[%s5475_s3 + $0x26c] sm:$0xf0]  ;;  %v3533_v11 = vld [vmem:[%s5475_s3 + $0x1c4] sm:$0xf]  ;;  %v2828_v15 = vor.u32 %v3569_v5, %v2825_v6 }
  0x29   :  { %1111 = vmatpush.bf16.msrb.mxu1 %v2680_v53  ;;  %v2487_v22 = vld [vmem:[%s5475_s3 + $0x40] sm:$0xf]  ;;  %v2632_v25 = vor.u32 %v3523_v18, %v2631_v17  ;;  %v3487_v26 = vld [vmem:[%s5475_s3 + $0x4c] sm:$0xf0]  ;;  %v2681_v12 = vld [vmem:[%s5475_s3 + $0x1d0] sm:$0xf0] }
  0x2a   :  { %1124 = vmatpush.bf16.msrb.mxu2 %v2808_v59  ;;  %v2759_v23 = vld [vmem:[%s5475_s3 + $0x260] sm:$0xf]  ;;  %v3587_v28 = vld [vmem:[%s5475_s3 + $0x36c] sm:$0xf0]  ;;  %v2488_v32 = vor.u32 %v3487_v26, %v2487_v22  ;;  %v3497_v18 = vld [vmem:[%s5475_s3 + $0xa4] sm:$0xf] }
  0x2b   :  { %1137 = vmatpush.bf16.msrb.mxu3 %v2936_v61  ;;  %v2887_v27 = vld [vmem:[%s5475_s3 + $0x360] sm:$0xf]  ;;  %v3519_v30 = vld [vmem:[%s5475_s3 + $0x14c] sm:$0xf0]  ;;  %v2760_v31 = vor.u32 %v3555_v24, %v2759_v23  ;;  %v2537_v22 = vld [vmem:[%s5475_s3 + $0xb0] sm:$0xf0] }
  0x2c   :  { %1099 = vmatpush.bf16.msrb.mxu0 %v2536_v60  ;;  %v2615_v29 = vld [vmem:[%s5475_s3 + $0x140] sm:$0xf]  ;;  %v2888_v33 = vor.u32 %v3587_v28, %v2887_v27  ;;  %v3551_v36 = vld [vmem:[%s5475_s3 + $0x24c] sm:$0xf0]  ;;  %v3597_v23 = vld [vmem:[%s5475_s3 + $0x3c4] sm:$0xf]  ;;  %v2540_v28 = vor.u32 %v3497_v18, %v2537_v22 }
  0x2d   :  { %1112 = vmatpush.bf16.msrb.mxu1 %v2664_v1  ;;  %v2471_v34 = vld [vmem:[%s5475_s3 + $0x20] sm:$0xf]  ;;  %v2616_v37 = vor.u32 %v3519_v30, %v2615_v29  ;;  %v3483_v38 = vld [vmem:[%s5475_s3 + $0x2c] sm:$0xf0]  ;;  %v2937_v24 = vld [vmem:[%s5475_s3 + $0x3d0] sm:$0xf0] }
  0x2e   :  { %1125 = vmatpush.bf16.msrb.mxu2 %v2792_v7  ;;  %v2743_v35 = vld [vmem:[%s5475_s3 + $0x240] sm:$0xf]  ;;  %v3583_v40 = vld [vmem:[%s5475_s3 + $0x34c] sm:$0xf0]  ;;  %v2472_v45 = vor.u32 %v3483_v38, %v2471_v34  ;;  %v2700_v7 = vor.u32 %v3537_v57, %v2697_v58  ;;  %v2665_v26 = vld [vmem:[%s5475_s3 + $0x1b0] sm:$0xf0]  ;;  %v2940_v29 = vor.u32 %v3597_v23, %v2937_v24 }
  0x2f   :  { %1138 = vmatpush.bf16.msrb.mxu3 %v2920_v9  ;;  %v2871_v39 = vld [vmem:[%s5475_s3 + $0x340] sm:$0xf]  ;;  %v3515_v42 = vld [vmem:[%s5475_s3 + $0x12c] sm:$0xf0]  ;;  %v2744_v43 = vor.u32 %v3551_v36, %v2743_v35  ;;  %v3601_v9 = vld [vmem:[%s5475_s3 + $0x3e4] sm:$0xf] }
  0x30   :  { %1100 = vmatpush.bf16.msrb.mxu0 %v2520_v8  ;;  %v2599_v41 = vld [vmem:[%s5475_s3 + $0x120] sm:$0xf]  ;;  %v2872_v46 = vor.u32 %v3583_v40, %v2871_v39  ;;  %v3479_v47 = vld [vmem:[%s5475_s3 + $0xc] sm:$0xf0]  ;;  %v2553_v8 = vld [vmem:[%s5475_s3 + $0xd0] sm:$0xf0]  ;;  %v2956_v17 = vor.u32 %v3601_v9, %v2953_v10 }
  0x31   :  { %1113 = vmatpush.bf16.msrb.mxu1 %v2648_v13  ;;  %v2455_v44 = vld [vmem:[%s5475_s3] sm:$0xf]  ;;  %v3547_v49 = vld [vmem:[%s5475_s3 + $0x22c] sm:$0xf0]  ;;  %v2600_v50 = vor.u32 %v3515_v42, %v2599_v41  ;;  %v2556_v16 = vor.u32 %v3501_v62, %v2553_v8  ;;  %v3493_v30 = vld [vmem:[%s5475_s3 + $0x84] sm:$0xf] }
  0x32   :  { %1126 = vmatpush.bf16.msrb.mxu2 %v2776_v19  ;;  %v2727_v48 = vld [vmem:[%s5475_s3 + $0x220] sm:$0xf]  ;;  %v3579_v53 = vld [vmem:[%s5475_s3 + $0x32c] sm:$0xf0]  ;;  %v2456_v60 = vor.u32 %v3479_v47, %v2455_v44  ;;  %v3565_v19 = vld [vmem:[%s5475_s3 + $0x2c4] sm:$0xf] }
  0x33   :  { %1139 = vmatpush.bf16.msrb.mxu3 %v2904_v21  ;;  %v2583_v51 = vld [vmem:[%s5475_s3 + $0x100] sm:$0xf]  ;;  %v3511_v54 = vld [vmem:[%s5475_s3 + $0x10c] sm:$0xf0]  ;;  %v2728_v59 = vor.u32 %v3547_v49, %v2727_v48  ;;  %v2684_v21 = vor.u32 %v3533_v11, %v2681_v12  ;;  %v2521_v34 = vld [vmem:[%s5475_s3 + $0x90] sm:$0xf0] }
  0x34   :  { %1101 = vmatpush.bf16.msrb.mxu0 %v2504_v20  ;;  %v2855_v52 = vld [vmem:[%s5475_s3 + $0x320] sm:$0xf]  ;;  %v3543_v0 = vld [vmem:[%s5475_s3 + $0x20c] sm:$0xf0]  ;;  %v2584_v2 = vor.u32 %v3511_v54, %v2583_v51  ;;  %v2809_v20 = vld [vmem:[%s5475_s3 + $0x2d0] sm:$0xf0]  ;;  %v2524_v40 = vor.u32 %v3493_v30, %v2521_v34 }
  0x35   :  { %1114 = vmatpush.bf16.msrb.mxu1 %v2632_v25  ;;  %v2856_v61 = vor.u32 %v3579_v53, %v2855_v52  ;;  %v2711_v63 = vld [vmem:[%s5475_s3 + $0x200] sm:$0xf]  ;;  %v3575_v4 = vld [vmem:[%s5475_s3 + $0x30c] sm:$0xf0]  ;;  %v3529_v25 = vld [vmem:[%s5475_s3 + $0x1a4] sm:$0xf]  ;;  %v2812_v27 = vor.u32 %v3565_v19, %v2809_v20 }
  0x36   :  { %1127 = vmatpush.bf16.msrb.mxu2 %v2760_v31  ;;  %v2839_v1 = vld [vmem:[%s5475_s3 + $0x300] sm:$0xf]  ;;  %v2712_v13 = vor.u32 %v3543_v0, %v2711_v63  ;;  %v3561_v31 = vld [vmem:[%s5475_s3 + $0x2a4] sm:$0xf]  ;;  %v2921_v36 = vld [vmem:[%s5475_s3 + $0x3b0] sm:$0xf0] }
  0x37   :  { %1140 = vmatpush.bf16.msrb.mxu3 %v2888_v33  ;;  %v2840_v14 = vor.u32 %v3575_v4, %v2839_v1  ;;  %v2668_v33 = vor.u32 %v3529_v25, %v2665_v26  ;;  %v3593_v35 = vld [vmem:[%s5475_s3 + $0x3a4] sm:$0xf]  ;;  %v2649_v38 = vld [vmem:[%s5475_s3 + $0x190] sm:$0xf0] }
  0x38   :  { %1102 = vmatpush.bf16.msrb.mxu0 %v2488_v32  ;;  %v2793_v32 = vld [vmem:[%s5475_s3 + $0x2b0] sm:$0xf0]  ;;  %v2924_v41 = vor.u32 %v3593_v35, %v2921_v36  ;;  %v3489_v42 = vld [vmem:[%s5475_s3 + $0x64] sm:$0xf] }
  0x39   :  { %1115 = vmatpush.bf16.msrb.mxu1 %v2616_v37  ;;  %v3525_v37 = vld [vmem:[%s5475_s3 + $0x184] sm:$0xf]  ;;  %v2796_v39 = vor.u32 %v3561_v31, %v2793_v32  ;;  %v2777_v44 = vld [vmem:[%s5475_s3 + $0x290] sm:$0xf0] }
  0x3a   :  { %1128 = vmatpush.bf16.msrb.mxu2 %v2744_v43  ;;  %v3557_v43 = vld [vmem:[%s5475_s3 + $0x284] sm:$0xf]  ;;  %v2905_v48 = vld [vmem:[%s5475_s3 + $0x390] sm:$0xf0] }
  0x3b   :  { %1141 = vmatpush.bf16.msrb.mxu3 %v2872_v46  ;;  %v2505_v46 = vld [vmem:[%s5475_s3 + $0x70] sm:$0xf0]  ;;  %v3589_v47 = vld [vmem:[%s5475_s3 + $0x384] sm:$0xf]  ;;  %v2780_v51 = vor.u32 %v3557_v43, %v2777_v44  ;;  %v3540_v44 = vld [vmem:[%s5475_s3 + $0x1f4] sm:$0xf0] }
  0x3c   :  { %1103 = vmatpush.bf16.msrb.mxu0 %v2472_v45  ;;  %v2652_v45 = vor.u32 %v3525_v37, %v2649_v38  ;;  %v3521_v49 = vld [vmem:[%s5475_s3 + $0x164] sm:$0xf]  ;;  %v2508_v52 = vor.u32 %v3489_v42, %v2505_v46  ;;  %v2908_v53 = vor.u32 %v3589_v47, %v2905_v48  ;;  %v2489_v56 = vld [vmem:[%s5475_s3 + $0x50] sm:$0xf0]  ;;  %v2703_v42 = vld [vmem:[%s5475_s3 + $0x1e8] sm:$0xf] }
  0x3d   :  { %1116 = vmatpush.bf16.msrb.mxu1 %v2600_v50  ;;  %v2633_v50 = vld [vmem:[%s5475_s3 + $0x170] sm:$0xf0]  ;;  %v3485_v55 = vld [vmem:[%s5475_s3 + $0x44] sm:$0xf] }
  0x3e   :  { %1129 = vmatpush.bf16.msrb.mxu2 %v2728_v59  ;;  %v2636_v54 = vor.u32 %v3521_v49, %v2633_v50  ;;  %v3517_v57 = vld [vmem:[%s5475_s3 + $0x144] sm:$0xf]  ;;  %v2617_v58 = vld [vmem:[%s5475_s3 + $0x150] sm:$0xf0]  ;;  %v2492_v59 = vor.u32 %v3485_v55, %v2489_v56 }
  0x3f   :  { %1142 = vmatpush.bf16.msrb.mxu3 %v2856_v61  ;;  %v3553_v61 = vld [vmem:[%s5475_s3 + $0x264] sm:$0xf]  ;;  %v2761_v62 = vld [vmem:[%s5475_s3 + $0x270] sm:$0xf0] }
  0x40   :  { %1104 = vmatpush.bf16.msrb.mxu0 %v2456_v60  ;;  %v2620_v60 = vor.u32 %v3517_v57, %v2617_v58  ;;  %v3585_v63 = vld [vmem:[%s5475_s3 + $0x364] sm:$0xf]  ;;  %v2764_v0 = vor.u32 %v3553_v61, %v2761_v62  ;;  %v2889_v1 = vld [vmem:[%s5475_s3 + $0x370] sm:$0xf0]  ;;  %v2687_v57 = vld [vmem:[%s5475_s3 + $0x1c8] sm:$0xf] }
  0x41   :  { %1117 = vmatpush.bf16.msrb.mxu1 %v2584_v2  ;;  %v2892_v2 = vor.u32 %v3585_v63, %v2889_v1  ;;  %v2473_v4 = vld [vmem:[%s5475_s3 + $0x30] sm:$0xf0]  ;;  %v3513_v5 = vld [vmem:[%s5475_s3 + $0x124] sm:$0xf]  ;;  %v3536_v58 = vld [vmem:[%s5475_s3 + $0x1d4] sm:$0xf0] }
  0x42   :  { %1130 = vmatpush.bf16.msrb.mxu2 %v2712_v13  ;;  %v3549_v9 = vld [vmem:[%s5475_s3 + $0x244] sm:$0xf]  ;;  %v2745_v10 = vld [vmem:[%s5475_s3 + $0x250] sm:$0xf0]  ;;  %v2831_v62 = vld [vmem:[%s5475_s3 + $0x2e8] sm:$0xf] }
  0x43   :  { %1143 = vmatpush.bf16.msrb.mxu3 %v2840_v14  ;;  %v3581_v11 = vld [vmem:[%s5475_s3 + $0x344] sm:$0xf]  ;;  %v2748_v12 = vor.u32 %v3549_v9, %v2745_v10  ;;  %v2873_v13 = vld [vmem:[%s5475_s3 + $0x350] sm:$0xf0]  ;;  %v3572_v63 = vld [vmem:[%s5475_s3 + $0x2f4] sm:$0xf0] }
  0x44   :  { %1149 = vmatpush.bf16.msra.mxu0 %v2572_v3  ;;  %v3481_v3 = vld [vmem:[%s5475_s3 + $0x24] sm:$0xf]  ;;  %v2876_v14 = vor.u32 %v3581_v11, %v2873_v13  ;;  %v2585_v19 = vld [vmem:[%s5475_s3 + $0x110] sm:$0xf0]  ;;  %v2671_v9 = vld [vmem:[%s5475_s3 + $0x1a8] sm:$0xf]  ;;  %v2832_v13 = vor.u32 %v3572_v63, %v2831_v62 }
  0x45   :  { %1162 = vmatpush.bf16.msra.mxu1 %v2700_v7  ;;  %v2476_v6 = vor.u32 %v3481_v3, %v2473_v4  ;;  %v2601_v7 = vld [vmem:[%s5475_s3 + $0x130] sm:$0xf0]  ;;  %v3577_v23 = vld [vmem:[%s5475_s3 + $0x324] sm:$0xf]  ;;  %v3604_v4 = vld [vmem:[%s5475_s3 + $0x3f4] sm:$0xf0] }
  0x46   :  { %1175 = vmatpush.bf16.msra.mxu2 %v2828_v15  ;;  %v2604_v8 = vor.u32 %v3513_v5, %v2601_v7  ;;  %v3477_v15 = vld [vmem:[%s5475_s3 + $0x4] sm:$0xf]  ;;  %v2729_v22 = vld [vmem:[%s5475_s3 + $0x230] sm:$0xf0]  ;;  %v2543_v5 = vld [vmem:[%s5475_s3 + $0xa8] sm:$0xf] }
  0x47   :  { %1188 = vmatpush.bf16.msra.mxu3 %v2956_v17  ;;  %v3509_v17 = vld [vmem:[%s5475_s3 + $0x104] sm:$0xf]  ;;  %v2857_v25 = vld [vmem:[%s5475_s3 + $0x330] sm:$0xf0]  ;;  %v3532_v11 = vld [vmem:[%s5475_s3 + $0x1b4] sm:$0xf0] }
  0x48   :  { %1150 = vmatpush.bf16.msra.mxu0 %v2556_v16  ;;  %v2457_v16 = vld [vmem:[%s5475_s3 + $0x10] sm:$0xf0]  ;;  %v2588_v20 = vor.u32 %v3509_v17, %v2585_v19  ;;  %v2860_v26 = vor.u32 %v3577_v23, %v2857_v25  ;;  %v3573_v30 = vld [vmem:[%s5475_s3 + $0x304] sm:$0xf]  ;;  %v3568_v19 = vld [vmem:[%s5475_s3 + $0x2d4] sm:$0xf0] }
  0x49   :  { %1163 = vmatpush.bf16.msra.mxu1 %v2684_v21  ;;  %v2460_v18 = vor.u32 %v3477_v15, %v2457_v16  ;;  %v3545_v21 = vld [vmem:[%s5475_s3 + $0x224] sm:$0xf]  ;;  %v2841_v31 = vld [vmem:[%s5475_s3 + $0x310] sm:$0xf0]  ;;  %v3600_v23 = vld [vmem:[%s5475_s3 + $0x3d4] sm:$0xf0] }
  0x4a   :  { %1176 = vmatpush.bf16.msra.mxu2 %v2812_v27  ;;  %v2732_v24 = vor.u32 %v3545_v21, %v2729_v22  ;;  %v3541_v27 = vld [vmem:[%s5475_s3 + $0x204] sm:$0xf]  ;;  %v2844_v32 = vor.u32 %v3573_v30, %v2841_v31  ;;  %v2672_v22 = vor.u32 %v3532_v11, %v2671_v9  ;;  %v3496_v25 = vld [vmem:[%s5475_s3 + $0x94] sm:$0xf0]  ;;  %v2895_v62 = vld [vmem:[%s5475_s3 + $0x368] sm:$0xf] }
  0x4b   :  { %1189 = vmatpush.bf16.msra.mxu3 %v2940_v29  ;;  %v3588_v63 = vld [vmem:[%s5475_s3 + $0x374] sm:$0xf0] }
  0x4c   :  { %1151 = vmatpush.bf16.msra.mxu0 %v2540_v28  ;;  %v2713_v28 = vld [vmem:[%s5475_s3 + $0x210] sm:$0xf0]  ;;  %v3584_v11 = vld [vmem:[%s5475_s3 + $0x354] sm:$0xf0] }
  0x4d   :  { %1164 = vmatpush.bf16.msra.mxu1 %v2668_v33  ;;  %v2716_v29 = vor.u32 %v3541_v27, %v2713_v28  ;;  %v44_v33 = vld [vmem:[%s5477_s2] sm:$0xf]  ;;  %v2655_v27 = vld [vmem:[%s5475_s3 + $0x188] sm:$0xf]  ;;  %v3528_v28 = vld [vmem:[%s5475_s3 + $0x194] sm:$0xf0] }
  0x4e   :  { %1177 = vmatpush.bf16.msra.mxu2 %v2796_v39  ;;  %v84_v34 = vperm.slane %v44_v33, 0  ;;  %v85_v35 = vperm.slane %v44_v33, 1  ;;  %v86_v46 = vperm.slane %v44_v33, 2  ;;  %v87_v48 = vperm.slane %v44_v33, 3  ;;  %v2799_v33 = vld [vmem:[%s5475_s3 + $0x2a8] sm:$0xf] }
  0x4f   :  { %1190 = vmatpush.bf16.msra.mxu3 %v2924_v41  ;;  %v3508_v41 = vld [vmem:[%s5475_s3 + $0xf4] sm:$0xf0] }
  0x50   :  { %1152 = vmatpush.bf16.msra.mxu0 %v2524_v40  ;;  %v2575_v40 = vld [vmem:[%s5475_s3 + $0xe8] sm:$0xf] }
  0x51   :  { %1165 = vmatpush.bf16.msra.mxu1 %v2652_v45  ;;  %v2576_v49 = vor.u32 %v3508_v41, %v2575_v40  ;;  %v2639_v40 = vld [vmem:[%s5475_s3 + $0x168] sm:$0xf]  ;;  %v3524_v41 = vld [vmem:[%s5475_s3 + $0x174] sm:$0xf0] }
  0x52   :  { %1178 = vmatpush.bf16.msra.mxu2 %v2780_v51 }
  0x53   :  { %1191 = vmatpush.bf16.msra.mxu3 %v2908_v53  ;;  %v2559_v53 = vld [vmem:[%s5475_s3 + $0xc8] sm:$0xf] }
  0x54   :  { %1153 = vmatpush.bf16.msra.mxu0 %v2508_v52  ;;  %v2704_v52 = vor.u32 %v3540_v44, %v2703_v42  ;;  %v2783_v44 = vld [vmem:[%s5475_s3 + $0x288] sm:$0xf] }
  0x55   :  { %1166 = vmatpush.bf16.msra.mxu1 %v2636_v54  ;;  %v3504_v54 = vld [vmem:[%s5475_s3 + $0xd4] sm:$0xf0] }
  0x56   :  { %1179 = vmatpush.bf16.msra.mxu2 %v2764_v0  ;;  %v2959_v0 = vld [vmem:[%s5475_s3 + $0x3e8] sm:$0xf]  ;;  %v2560_v3 = vor.u32 %v3504_v54, %v2559_v53  ;;  %v3520_v54 = vld [vmem:[%s5475_s3 + $0x154] sm:$0xf0] }
  0x57   :  { %1192 = vmatpush.bf16.msra.mxu3 %v2892_v2  ;;  %v2960_v16 = vor.u32 %v3604_v4, %v2959_v0  ;;  %v2623_v53 = vld [vmem:[%s5475_s3 + $0x148] sm:$0xf] }
  0x58   :  { %1154 = vmatpush.bf16.msra.mxu0 %v2492_v59  ;;  %v2479_v0 = vld [vmem:[%s5475_s3 + $0x28] sm:$0xf] }
  0x59   :  { %1167 = vmatpush.bf16.msra.mxu1 %v2620_v60 }
  0x5a   :  { %1180 = vmatpush.bf16.msra.mxu2 %v2748_v12 }
  0x5b   :  { %1193 = vmatpush.bf16.msra.mxu3 %v2876_v14 }
  0x5c   :  { %1155 = vmatpush.bf16.msra.mxu0 %v2476_v6  ;;  %v3500_v6 = vld [vmem:[%s5475_s3 + $0xb4] sm:$0xf0] }
  0x5d   :  { %1168 = vmatpush.bf16.msra.mxu1 %v2604_v8  ;;  %v2688_v8 = vor.u32 %v3536_v58, %v2687_v57  ;;  %v2544_v17 = vor.u32 %v3500_v6, %v2543_v5  ;;  %v2767_v58 = vld [vmem:[%s5475_s3 + $0x268] sm:$0xf]  ;;  %v2896_v5 = vor.u32 %v3588_v63, %v2895_v62  ;;  %v3598_v62 = vld [vmem:[%s5475_s3 + $0x3cc] sm:$0xf]  ;;  %v2945_v63 = vld [vmem:[%s5475_s3 + $0x3d8] sm:$0xf0] }
  0x5e   :  { %1181 = vmatpush.bf16.msra.mxu2 %v2732_v24  ;;  %v2527_v24 = vld [vmem:[%s5475_s3 + $0x88] sm:$0xf] }
  0x5f   :  { %1194 = vmatpush.bf16.msra.mxu3 %v2860_v26  ;;  %v2751_v6 = vld [vmem:[%s5475_s3 + $0x248] sm:$0xf] }
  0x60   :  { %1156 = vmatpush.bf16.msra.mxu0 %v2460_v18  ;;  %v2815_v18 = vld [vmem:[%s5475_s3 + $0x2c8] sm:$0xf] }
  0x61   :  { %1169 = vmatpush.bf16.msra.mxu1 %v2588_v20  ;;  %v2943_v20 = vld [vmem:[%s5475_s3 + $0x3c8] sm:$0xf]  ;;  %v2816_v30 = vor.u32 %v3568_v19, %v2815_v18  ;;  %v2577_v19 = vld [vmem:[%s5475_s3 + $0xf8] sm:$0xf0] }
  0x62   :  { %1182 = vmatpush.bf16.msra.mxu2 %v2716_v29  ;;  %v2944_v31 = vor.u32 %v3600_v23, %v2943_v20  ;;  %v3538_v20 = vld [vmem:[%s5475_s3 + $0x1ec] sm:$0xf] }
  0x63   :  { %1195 = vmatpush.bf16.msra.mxu3 %v2844_v32  ;;  %v2528_v32 = vor.u32 %v3496_v25, %v2527_v24  ;;  %v2735_v24 = vld [vmem:[%s5475_s3 + $0x228] sm:$0xf]  ;;  %v3548_v25 = vld [vmem:[%s5475_s3 + $0x234] sm:$0xf0] }
  0xa0   :  { %v261_v36 = vpop.f32.mrf.mxu0 }
  0xa1   :  { %v262_v37 = vadd.f32 %v261_v36, %v84_v34  ;;  %v274_v38 = vpop.f32.mrf.mxu1  ;;  %v3564_v34 = vld [vmem:[%s5475_s3 + $0x2b4] sm:$0xf0]  ;;  %v2927_v36 = vld [vmem:[%s5475_s3 + $0x3a8] sm:$0xf] }
  0xa2   :  { %v275_v39 = vadd.f32 %v274_v38, %v85_v35  ;;  %v2656_v35 = vor.u32 %v3528_v28, %v2655_v27  ;;  %v2511_v38 = vld [vmem:[%s5475_s3 + $0x68] sm:$0xf]  ;;  %v2800_v42 = vor.u32 %v3564_v34, %v2799_v33  ;;  %v2736_v33 = vor.u32 %v3548_v25, %v2735_v24  ;;  %v2561_v34 = vld [vmem:[%s5475_s3 + $0xd8] sm:$0xf0]  ;;  %v3590_v24 = vld [vmem:[%s5475_s3 + $0x38c] sm:$0xf] }
  0xa3   :  { %vm304_vm0 = vcmp.gt.f32.partialorder %v262_v37, 0.0  ;;  %v308_v43 = vmul.f32 0.01, %v262_v37  ;;  %v2863_v28 = vld [vmem:[%s5475_s3 + $0x328] sm:$0xf] }
  0xa4   :  { %vm305_vm1 = vcmp.gt.f32.partialorder %v275_v39, 0.0  ;;  %v309_v45 = vmul.f32 0.01, %v275_v39  ;;  %v2913_v25 = vld [vmem:[%s5475_s3 + $0x398] sm:$0xf0] }
  0xa5   :  { %v312_v47 = vsel %vm304_vm0, %v262_v37, %v308_v43  ;;  %v3596_v37 = vld [vmem:[%s5475_s3 + $0x3b4] sm:$0xf0] }
  0xa6   :  { %v4391_v50 = vpack.c.bf16 %v312_v47, %v312_v47  ;;  %v313_v51 = vsel %vm305_vm1, %v275_v39, %v309_v45  ;;  %v3492_v39 = vld [vmem:[%s5475_s3 + $0x74] sm:$0xf0]  ;;  %v2928_v43 = vor.u32 %v3596_v37, %v2927_v36  ;;  %v2640_v47 = vor.u32 %v3524_v41, %v2639_v40  ;;  %v2689_v36 = vld [vmem:[%s5475_s3 + $0x1d8] sm:$0xf0]  ;;  %v2847_v40 = vld [vmem:[%s5475_s3 + $0x308] sm:$0xf] }
  0xa7   :  { %v4399_v55 = vpack.c.bf16 %v313_v51, %v313_v51  ;;  %v3560_v45 = vld [vmem:[%s5475_s3 + $0x294] sm:$0xf0]  ;;  %v2495_v51 = vld [vmem:[%s5475_s3 + $0x48] sm:$0xf] }
  0xa8   :  { %v287_v56 = vpop.f32.mrf.mxu2  ;;  %v263_v61 = vpop.f32.mrf.mxu0  ;;  %1105 = vmatmul.bf16.vlgmr.msrb.gmra.mxu0 %v4391_v50  ;;  %v3576_v41 = vld [vmem:[%s5475_s3 + $0x314] sm:$0xf0] }
  0xa9   :  { %v288_v59 = vadd.f32 %v287_v56, %v86_v46  ;;  %v300_v60 = vpop.f32.mrf.mxu3  ;;  %1118 = vmatmul.bf16.vlgmr.msrb.gmra.mxu1 %v4399_v55  ;;  %1201 = vmatpush.bf16.msrb.mxu0 %v2576_v49  ;;  %v276_v2 = vpop.f32.mrf.mxu1  ;;  %v2512_v46 = vor.u32 %v3492_v39, %v2511_v38  ;;  %v3592_v49 = vld [vmem:[%s5475_s3 + $0x394] sm:$0xf0]  ;;  %v2784_v56 = vor.u32 %v3560_v45, %v2783_v44  ;;  %v2719_v38 = vld [vmem:[%s5475_s3 + $0x208] sm:$0xf] }
  0xaa   :  { %v301_v1 = vadd.f32 %v300_v60, %v87_v48  ;;  %1214 = vmatpush.bf16.msrb.mxu1 %v2704_v52  ;;  %v2911_v48 = vld [vmem:[%s5475_s3 + $0x388] sm:$0xf]  ;;  %v3488_v52 = vld [vmem:[%s5475_s3 + $0x54] sm:$0xf0]  ;;  %v2624_v61 = vor.u32 %v3520_v54, %v2623_v53  ;;  %v2673_v53 = vld [vmem:[%s5475_s3 + $0x1b8] sm:$0xf0]  ;;  %v2848_v54 = vor.u32 %v3576_v41, %v2847_v40 }
  0xab   :  { %vm306_vm2 = vcmp.gt.f32.partialorder %v288_v59, 0.0  ;;  %v310_v7 = vmul.f32 0.01, %v288_v59  ;;  %v2912_v57 = vor.u32 %v3592_v49, %v2911_v48  ;;  %v2496_v60 = vor.u32 %v3488_v52, %v2495_v51  ;;  %v2607_v2 = vld [vmem:[%s5475_s3 + $0x128] sm:$0xf] }
  0xac   :  { %vm307_vm3 = vcmp.gt.f32.partialorder %v301_v1, 0.0  ;;  %v311_v10 = vmul.f32 0.01, %v301_v1  ;;  %v3544_v39 = vld [vmem:[%s5475_s3 + $0x214] sm:$0xf0] }
  0xad   :  { %v314_v12 = vsel %vm306_vm2, %v288_v59, %v310_v7  ;;  %1202 = vmatpush.bf16.msrb.mxu0 %v2560_v3  ;;  %v3556_v59 = vld [vmem:[%s5475_s3 + $0x274] sm:$0xf0]  ;;  %v3498_v48 = vld [vmem:[%s5475_s3 + $0xac] sm:$0xf]  ;;  %v2720_v49 = vor.u32 %v3544_v39, %v2719_v38  ;;  %v2545_v51 = vld [vmem:[%s5475_s3 + $0xb8] sm:$0xf0] }
  0xae   :  { %v4433_v14 = vpack.c.bf16 %v314_v12, %v314_v12  ;;  %v315_v15 = vsel %vm307_vm3, %v301_v1, %v311_v10  ;;  %1215 = vmatpush.bf16.msrb.mxu1 %v2688_v8  ;;  %v3484_v1 = vld [vmem:[%s5475_s3 + $0x34] sm:$0xf0]  ;;  %v2768_v4 = vor.u32 %v3556_v59, %v2767_v58  ;;  %v2879_v8 = vld [vmem:[%s5475_s3 + $0x348] sm:$0xf]  ;;  %v3530_v52 = vld [vmem:[%s5475_s3 + $0x1ac] sm:$0xf] }
  0xaf   :  { %v4444_v21 = vpack.c.bf16 %v315_v15, %v315_v15  ;;  %v3516_v3 = vld [vmem:[%s5475_s3 + $0x134] sm:$0xf0]  ;;  %v2480_v9 = vor.u32 %v3484_v1, %v2479_v0  ;;  %v2463_v12 = vld [vmem:[%s5475_s3 + $0x8] sm:$0xf]  ;;  %v2880_v23 = vor.u32 %v3584_v11, %v2879_v8  ;;  %v3566_v58 = vld [vmem:[%s5475_s3 + $0x2cc] sm:$0xf] }
  0xb0   :  { %v289_v26 = vpop.f32.mrf.mxu2  ;;  %1131 = vmatmul.bf16.vlgmr.msrb.gmra.mxu2 %v4433_v14  ;;  %v3552_v7 = vld [vmem:[%s5475_s3 + $0x254] sm:$0xf0]  ;;  %v2608_v10 = vor.u32 %v3516_v3, %v2607_v2  ;;  %v2591_v15 = vld [vmem:[%s5475_s3 + $0x108] sm:$0xf]  ;;  %v2817_v59 = vld [vmem:[%s5475_s3 + $0x2d8] sm:$0xf0] }
  0xb1   :  { %v302_v29 = vpop.f32.mrf.mxu3  ;;  %1144 = vmatmul.bf16.vlgmr.msrb.gmra.mxu3 %v4444_v21  ;;  %1227 = vmatpush.bf16.msrb.mxu2 %v2832_v13  ;;  %v3480_v13 = vld [vmem:[%s5475_s3 + $0x14] sm:$0xf0]  ;;  %v2752_v18 = vor.u32 %v3552_v7, %v2751_v6  ;;  %v3494_v0 = vld [vmem:[%s5475_s3 + $0x8c] sm:$0xf]  ;;  %v2529_v1 = vld [vmem:[%s5475_s3 + $0x98] sm:$0xf0] }
  0xb2   :  { %1240 = vmatpush.bf16.msrb.mxu3 %v2960_v16  ;;  %1203 = vmatpush.bf16.msrb.mxu0 %v2544_v17  ;;  %v3512_v16 = vld [vmem:[%s5475_s3 + $0x114] sm:$0xf0]  ;;  %v3506_v17 = vld [vmem:[%s5475_s3 + $0xec] sm:$0xf]  ;;  %v2464_v26 = vor.u32 %v3480_v13, %v2463_v12  ;;  %v2657_v3 = vld [vmem:[%s5475_s3 + $0x198] sm:$0xf0]  ;;  %v2532_v8 = vor.u32 %v3494_v0, %v2529_v1 }
  0xb3   :  { %1216 = vmatpush.bf16.msrb.mxu1 %v2672_v22  ;;  %v2705_v22 = vld [vmem:[%s5475_s3 + $0x1f8] sm:$0xf0]  ;;  %v2592_v27 = vor.u32 %v3512_v16, %v2591_v15  ;;  %v3580_v29 = vld [vmem:[%s5475_s3 + $0x334] sm:$0xf0]  ;;  %v3526_v2 = vld [vmem:[%s5475_s3 + $0x18c] sm:$0xf] }
  0xb4   :  { %v2864_v37 = vor.u32 %v3580_v29, %v2863_v28  ;;  %v3562_v6 = vld [vmem:[%s5475_s3 + $0x2ac] sm:$0xf]  ;;  %v2801_v7 = vld [vmem:[%s5475_s3 + $0x2b8] sm:$0xf0] }
  0xb5   :  { %1228 = vmatpush.bf16.msrb.mxu2 %v2816_v30  ;;  %v2580_v30 = vor.u32 %v3506_v17, %v2577_v19  ;;  %v2929_v11 = vld [vmem:[%s5475_s3 + $0x3b8] sm:$0xf0]  ;;  %v3490_v12 = vld [vmem:[%s5475_s3 + $0x6c] sm:$0xf]  ;;  %v2804_v17 = vor.u32 %v3562_v6, %v2801_v7 }
  0xb6   :  { %1241 = vmatpush.bf16.msrb.mxu3 %v2944_v31  ;;  %1204 = vmatpush.bf16.msrb.mxu0 %v2528_v32  ;;  %v2708_v31 = vor.u32 %v3538_v20, %v2705_v22  ;;  %v3502_v32 = vld [vmem:[%s5475_s3 + $0xcc] sm:$0xf]  ;;  %v2513_v13 = vld [vmem:[%s5475_s3 + $0x78] sm:$0xf0] }
  0xb7   :  { %1217 = vmatpush.bf16.msrb.mxu1 %v2656_v35  ;;  %v3534_v35 = vld [vmem:[%s5475_s3 + $0x1cc] sm:$0xf]  ;;  %v2564_v44 = vor.u32 %v3502_v32, %v2561_v34  ;;  %v2641_v16 = vld [vmem:[%s5475_s3 + $0x178] sm:$0xf0]  ;;  %v2516_v22 = vor.u32 %v3490_v12, %v2513_v13 }
  0xb8   :  { %1157 = vmatmul.bf16.vlgmr.msra.gmra.mxu0 %v4391_v50  ;;  %v2692_v45 = vor.u32 %v3534_v35, %v2689_v36  ;;  %v3522_v15 = vld [vmem:[%s5475_s3 + $0x16c] sm:$0xf]  ;;  %v2785_v20 = vld [vmem:[%s5475_s3 + $0x298] sm:$0xf0] }
  0xb9   :  { %1229 = vmatpush.bf16.msrb.mxu2 %v2800_v42  ;;  %1170 = vmatmul.bf16.vlgmr.msra.gmra.mxu1 %v4399_v55  ;;  %v3570_v42 = vld [vmem:[%s5475_s3 + $0x2ec] sm:$0xf]  ;;  %v2625_v29 = vld [vmem:[%s5475_s3 + $0x158] sm:$0xf0] }
  0xba   :  { %1242 = vmatpush.bf16.msrb.mxu3 %v2928_v43  ;;  %1205 = vmatpush.bf16.msrb.mxu0 %v2512_v46  ;;  %v2833_v43 = vld [vmem:[%s5475_s3 + $0x2f8] sm:$0xf0]  ;;  %v3602_v46 = vld [vmem:[%s5475_s3 + $0x3ec] sm:$0xf] }
  0xbb   :  { %1218 = vmatpush.bf16.msrb.mxu1 %v2640_v47  ;;  %v2961_v47 = vld [vmem:[%s5475_s3 + $0x3f8] sm:$0xf0]  ;;  %v3558_v19 = vld [vmem:[%s5475_s3 + $0x28c] sm:$0xf] }
  0xbc   :  { %v3518_v28 = vld [vmem:[%s5475_s3 + $0x14c] sm:$0xf]  ;;  %v2481_v39 = vld [vmem:[%s5475_s3 + $0x38] sm:$0xf0] }
  0xbd   :  { %1230 = vmatpush.bf16.msrb.mxu2 %v2784_v56  ;;  %v2836_v56 = vor.u32 %v3570_v42, %v2833_v43  ;;  %v3554_v32 = vld [vmem:[%s5475_s3 + $0x26c] sm:$0xf]  ;;  %v2628_v35 = vor.u32 %v3518_v28, %v2625_v29  ;;  %v2609_v41 = vld [vmem:[%s5475_s3 + $0x138] sm:$0xf0]  ;;  %v2983_v29 = vld [vmem:[%s5478_s5 + $0x20] sm:$0xf] }
  0xbe   :  { %1243 = vmatpush.bf16.msrb.mxu3 %v2912_v57  ;;  %1206 = vmatpush.bf16.msrb.mxu0 %v2496_v60  ;;  %v2964_v57 = vor.u32 %v3602_v46, %v2961_v47  ;;  %v2548_v60 = vor.u32 %v3498_v48, %v2545_v51  ;;  %v3586_v36 = vld [vmem:[%s5475_s3 + $0x36c] sm:$0xf]  ;;  %v2721_v13 = vld [vmem:[%s5475_s3 + $0x218] sm:$0xf0] }
  0xbf   :  { %1219 = vmatpush.bf16.msrb.mxu1 %v2624_v61  ;;  %v2676_v61 = vor.u32 %v3530_v52, %v2673_v53  ;;  %v3482_v38 = vld [vmem:[%s5475_s3 + $0x2c] sm:$0xf]  ;;  %v2465_v52 = vld [vmem:[%s5475_s3 + $0x18] sm:$0xf0] }
  0xc0   :  { %1183 = vmatmul.bf16.vlgmr.msra.gmra.mxu2 %v4433_v14  ;;  %v3514_v40 = vld [vmem:[%s5475_s3 + $0x12c] sm:$0xf]  ;;  %v2484_v47 = vor.u32 %v3482_v38, %v2481_v39  ;;  %v3063_v38 = vld [vmem:[%s5478_s5 + $0xc0] sm:$0xf]  ;;  %v3630_v39 = vld [vmem:[%s5478_s5 + $0xc4] sm:$0xf0] }
  0xc1   :  { %1196 = vmatmul.bf16.vlgmr.msra.gmra.mxu3 %v4444_v21  ;;  %1231 = vmatpush.bf16.msrb.mxu2 %v2768_v4  ;;  %v2820_v4 = vor.u32 %v3566_v58, %v2817_v59  ;;  %v3582_v46 = vld [vmem:[%s5475_s3 + $0x34c] sm:$0xf]  ;;  %v2612_v48 = vor.u32 %v3514_v40, %v2609_v41  ;;  %v3620_v58 = vld [vmem:[%s5478_s5 + $0x74] sm:$0xf0]  ;;  %v3087_v59 = vld [vmem:[%s5478_s5 + $0xf0] sm:$0xf] }
  0xc2   :  { %1244 = vmatpush.bf16.msrb.mxu3 %v2896_v5  ;;  %1207 = vmatpush.bf16.msrb.mxu0 %v2480_v9  ;;  %v2948_v5 = vor.u32 %v3598_v62, %v2945_v63  ;;  %v2660_v9 = vor.u32 %v3526_v2, %v2657_v3  ;;  %v3478_v51 = vld [vmem:[%s5475_s3 + $0xc] sm:$0xf]  ;;  %v2737_v63 = vld [vmem:[%s5475_s3 + $0x238] sm:$0xf0]  ;;  %v3619_v40 = vld [vmem:[%s5478_s5 + $0x74] sm:$0xf] }
  0xc3   :  { %1220 = vmatpush.bf16.msrb.mxu1 %v2608_v10  ;;  %v3594_v10 = vld [vmem:[%s5475_s3 + $0x3ac] sm:$0xf]  ;;  %v2468_v0 = vor.u32 %v3478_v51, %v2465_v52  ;;  %v2865_v3 = vld [vmem:[%s5475_s3 + $0x338] sm:$0xf0]  ;;  %v3617_v51 = vld [vmem:[%s5478_s5 + $0x64] sm:$0xf] }
  0xc4   :  { %v3510_v53 = vld [vmem:[%s5475_s3 + $0x10c] sm:$0xf] }
  0xc5   :  { %1232 = vmatpush.bf16.msrb.mxu2 %v2752_v18  ;;  %v2932_v18 = vor.u32 %v3594_v10, %v2929_v11  ;;  %v3546_v62 = vld [vmem:[%s5475_s3 + $0x22c] sm:$0xf]  ;;  %v3634_v10 = vld [vmem:[%s5478_s5 + $0xe4] sm:$0xf0] }
  0xc6   :  { %1245 = vmatpush.bf16.msrb.mxu3 %v2880_v23  ;;  %1208 = vmatpush.bf16.msrb.mxu0 %v2464_v26  ;;  %v2644_v23 = vor.u32 %v3522_v15, %v2641_v16  ;;  %v3486_v26 = vld [vmem:[%s5475_s3 + $0x4c] sm:$0xf]  ;;  %v2740_v7 = vor.u32 %v3546_v62, %v2737_v63  ;;  %v2849_v16 = vld [vmem:[%s5475_s3 + $0x318] sm:$0xf0] }
  0xc7   :  { %1221 = vmatpush.bf16.msrb.mxu1 %v2592_v27  ;;  %v2497_v27 = vld [vmem:[%s5475_s3 + $0x58] sm:$0xf0]  ;;  %v3578_v2 = vld [vmem:[%s5475_s3 + $0x32c] sm:$0xf] }
  0xc8   :  { %v2500_v34 = vor.u32 %v3486_v26, %v2497_v27  ;;  %v2868_v11 = vor.u32 %v3578_v2, %v2865_v3  ;;  %v3542_v12 = vld [vmem:[%s5475_s3 + $0x20c] sm:$0xf]  ;;  %v3614_v26 = vld [vmem:[%s5478_s5 + $0x44] sm:$0xf0]  ;;  %v3612_v27 = vld [vmem:[%s5478_s5 + $0x34] sm:$0xf0] }
  0xc9   :  { %1233 = vmatpush.bf16.msrb.mxu2 %v2736_v33  ;;  %1209 = vmatmul.bf16.vlgmr.msrb.gmra.mxu0 %v4391_v50  ;;  %v2769_v33 = vld [vmem:[%s5475_s3 + $0x278] sm:$0xf0]  ;;  %v3574_v15 = vld [vmem:[%s5475_s3 + $0x30c] sm:$0xf]  ;;  %v3624_v2 = vld [vmem:[%s5478_s5 + $0x94] sm:$0xf0] }
  0xca   :  { %1253 = vmatpush.bf16.msra.mxu0 %v2580_v30  ;;  %1246 = vmatpush.bf16.msrb.mxu3 %v2864_v37  ;;  %v2788_v30 = vor.u32 %v3558_v19, %v2785_v20  ;;  %v2897_v37 = vld [vmem:[%s5475_s3 + $0x378] sm:$0xf0]  ;;  %v2772_v42 = vor.u32 %v3554_v32, %v2769_v33  ;;  %v2724_v19 = vor.u32 %v3542_v12, %v2721_v13  ;;  %v3007_v20 = vld [vmem:[%s5478_s5 + $0x50] sm:$0xf]  ;;  %v3017_v52 = vld [vmem:[%s5478_s5 + $0x68] sm:$0xf0] }
  0xcb   :  { %1266 = vmatpush.bf16.msra.mxu1 %v2708_v31  ;;  %v2916_v31 = vor.u32 %v3590_v24, %v2913_v25  ;;  %v2900_v43 = vor.u32 %v3586_v36, %v2897_v37  ;;  %v2999_v25 = vld [vmem:[%s5478_s5 + $0x40] sm:$0xf]  ;;  %v3071_v32 = vld [vmem:[%s5478_s5 + $0xd0] sm:$0xf]  ;;  %v3606_v36 = vld [vmem:[%s5478_s5 + $0x4] sm:$0xf0] }
  0xcc   :  { %1222 = vmatmul.bf16.vlgmr.msrb.gmra.mxu1 %v4399_v55  ;;  %v3009_v62 = vld [vmem:[%s5478_s5 + $0x58] sm:$0xf0]  ;;  %v3127_v12 = vld [vmem:[%s5478_s5 + $0x140] sm:$0xf] }
  0xcd   :  { %1234 = vmatpush.bf16.msrb.mxu2 %v2720_v49  ;;  %v2881_v49 = vld [vmem:[%s5475_s3 + $0x358] sm:$0xf0] }
  0xce   :  { %1254 = vmatpush.bf16.msra.mxu0 %v2564_v44  ;;  %1247 = vmatpush.bf16.msrb.mxu3 %v2848_v54  ;;  %v3550_v44 = vld [vmem:[%s5475_s3 + $0x24c] sm:$0xf]  ;;  %v2593_v54 = vld [vmem:[%s5475_s3 + $0x118] sm:$0xf0] }
  0xcf   :  { %1267 = vmatpush.bf16.msra.mxu1 %v2692_v45  ;;  %v2753_v45 = vld [vmem:[%s5475_s3 + $0x258] sm:$0xf0]  ;;  %v2596_v1 = vor.u32 %v3510_v53, %v2593_v54  ;;  %v3020_v54 = vor.u32 %v3617_v51, %v3017_v52  ;;  %v3095_v52 = vld [vmem:[%s5478_s5 + $0x100] sm:$0xf] }
  0xd0   :  { %1235 = vmatmul.bf16.vlgmr.msrb.gmra.mxu2 %v4433_v14 }
  0xd1   :  { %1279 = vmatpush.bf16.msra.mxu2 %v2836_v56  ;;  %1248 = vmatmul.bf16.vlgmr.msrb.gmra.mxu3 %v4444_v21  ;;  %v3023_v56 = vld [vmem:[%s5478_s5 + $0x70] sm:$0xf] }
  0xd2   :  { %1292 = vmatpush.bf16.msra.mxu3 %v2964_v57  ;;  %1255 = vmatpush.bf16.msra.mxu0 %v2548_v60  ;;  %v2756_v57 = vor.u32 %v3550_v44, %v2753_v45  ;;  %v3636_v60 = vld [vmem:[%s5478_s5 + $0xf4] sm:$0xf0]  ;;  %v3055_v45 = vld [vmem:[%s5478_s5 + $0xb0] sm:$0xf] }
  0xd3   :  { %1268 = vmatpush.bf16.msra.mxu1 %v2676_v61  ;;  %v2884_v61 = vor.u32 %v3582_v46, %v2881_v49  ;;  %v3088_v6 = vor.u32 %v3636_v60, %v3087_v59  ;;  %v3628_v46 = vld [vmem:[%s5478_s5 + $0xb4] sm:$0xf0]  ;;  %v3650_v60 = vld [vmem:[%s5478_s5 + $0x164] sm:$0xf0] }
  0xd4   :  { %v3652_v49 = vld [vmem:[%s5478_s5 + $0x174] sm:$0xf0] }
  0xd5   :  { %1280 = vmatpush.bf16.msra.mxu2 %v2820_v4  ;;  %v3024_v4 = vor.u32 %v3620_v58, %v3023_v56  ;;  %v3047_v56 = vld [vmem:[%s5478_s5 + $0xa0] sm:$0xf] }
  0xd6   :  { %1293 = vmatpush.bf16.msra.mxu3 %v2948_v5  ;;  %1256 = vmatpush.bf16.msra.mxu0 %v2532_v8  ;;  %v3015_v5 = vld [vmem:[%s5478_s5 + $0x60] sm:$0xf]  ;;  %v3618_v8 = vld [vmem:[%s5478_s5 + $0x64] sm:$0xf0] }
  0xd7   :  { %1269 = vmatpush.bf16.msra.mxu1 %v2660_v9  ;;  %v3079_v9 = vld [vmem:[%s5478_s5 + $0xe0] sm:$0xf] }
  0xd8   :  { %v3143_v58 = vld [vmem:[%s5478_s5 + $0x160] sm:$0xf] }
  0xd9   :  { %1281 = vmatpush.bf16.msra.mxu2 %v2804_v17  ;;  %v3016_v17 = vor.u32 %v3618_v8, %v3015_v5  ;;  %v3144_v63 = vor.u32 %v3650_v60, %v3143_v58  ;;  %v3648_v5 = vld [vmem:[%s5478_s5 + $0x154] sm:$0xf0]  ;;  %v3001_v8 = vld [vmem:[%s5478_s5 + $0x48] sm:$0xf0]  ;;  %v3627_v58 = vld [vmem:[%s5478_s5 + $0xb4] sm:$0xf] }
  0xda   :  { %1294 = vmatpush.bf16.msra.mxu3 %v2932_v18  ;;  %1257 = vmatpush.bf16.msra.mxu0 %v2516_v22  ;;  %v3080_v18 = vor.u32 %v3634_v10, %v3079_v9  ;;  %v3616_v22 = vld [vmem:[%s5478_s5 + $0x54] sm:$0xf0]  ;;  %v3031_v10 = vld [vmem:[%s5478_s5 + $0x80] sm:$0xf] }
  0xdb   :  { %1270 = vmatpush.bf16.msra.mxu1 %v2644_v23  ;;  %v2852_v23 = vor.u32 %v3574_v15, %v2849_v16  ;;  %v3008_v24 = vor.u32 %v3616_v22, %v3007_v20  ;;  %v3646_v15 = vld [vmem:[%s5478_s5 + $0x144] sm:$0xf0]  ;;  %v3611_v16 = vld [vmem:[%s5478_s5 + $0x34] sm:$0xf]  ;;  %v3089_v22 = vld [vmem:[%s5478_s5 + $0xf8] sm:$0xf0] }
  0xdc   :  { %v3635_v20 = vld [vmem:[%s5478_s5 + $0xf4] sm:$0xf] }
  0xdd   :  { %1282 = vmatpush.bf16.msra.mxu2 %v2788_v30  ;;  %v2975_v30 = vld [vmem:[%s5478_s5 + $0x10] sm:$0xf] }
  0xde   :  { %1295 = vmatpush.bf16.msra.mxu3 %v2916_v31  ;;  %1258 = vmatpush.bf16.msra.mxu0 %v2500_v34  ;;  %v3608_v31 = vld [vmem:[%s5478_s5 + $0x14] sm:$0xf0] }
  0xdf   :  { %1271 = vmatpush.bf16.msra.mxu1 %v2628_v35  ;;  %v2976_v33 = vor.u32 %v3608_v31, %v2975_v30  ;;  %v3632_v34 = vld [vmem:[%s5478_s5 + $0xd4] sm:$0xf0]  ;;  %v2967_v35 = vld [vmem:[%s5478_s5] sm:$0xf]  ;;  %v3642_v30 = vld [vmem:[%s5478_s5 + $0x124] sm:$0xf0] }
  0xe0   :  { %v3072_v37 = vor.u32 %v3632_v34, %v3071_v32  ;;  %v2968_v41 = vor.u32 %v3606_v36, %v2967_v35  ;;  %v3607_v32 = vld [vmem:[%s5478_s5 + $0x14] sm:$0xf] }
  0xe1   :  { %1283 = vmatpush.bf16.msra.mxu2 %v2772_v42  ;;  %v3025_v42 = vld [vmem:[%s5478_s5 + $0x78] sm:$0xf0]  ;;  %v3631_v34 = vld [vmem:[%s5478_s5 + $0xd4] sm:$0xf] }
  0xe2   :  { %1296 = vmatpush.bf16.msra.mxu3 %v2900_v43  ;;  %1259 = vmatpush.bf16.msra.mxu0 %v2484_v47  ;;  %v3064_v43 = vor.u32 %v3630_v39, %v3063_v38  ;;  %v3028_v44 = vor.u32 %v3619_v40, %v3025_v42  ;;  %v3151_v47 = vld [vmem:[%s5478_s5 + $0x170] sm:$0xf]  ;;  %v4982_v38 = vld [vmem:[%s5479_s4] sm:$0xf]  ;;  %v3640_v42 = vld [vmem:[%s5478_s5 + $0x114] sm:$0xf0] }
  0xe3   :  { %1272 = vmatpush.bf16.msra.mxu1 %v2612_v48  ;;  %v3056_v48 = vor.u32 %v3628_v46, %v3055_v45  ;;  %v3152_v53 = vor.u32 %v3652_v49, %v3151_v47  ;;  %v2969_v45 = vld [vmem:[%s5478_s5 + $0x8] sm:$0xf0]  ;;  %v3629_v46 = vld [vmem:[%s5478_s5 + $0xc4] sm:$0xf]  ;;  %v449_v47 = vperm.slane %v4982_v38, 0 }
  0xe4   :  { %v3065_v49 = vld [vmem:[%s5478_s5 + $0xc8] sm:$0xf0] }
  0xe5   :  { %1284 = vmatpush.bf16.msra.mxu2 %v2756_v57  ;;  %v3626_v57 = vld [vmem:[%s5478_s5 + $0xa4] sm:$0xf0]  ;;  %v3068_v51 = vor.u32 %v3629_v46, %v3065_v49  ;;  %v3643_v46 = vld [vmem:[%s5478_s5 + $0x134] sm:$0xf] }
  0xe6   :  { %1297 = vmatpush.bf16.msra.mxu3 %v2884_v61  ;;  %1260 = vmatpush.bf16.msra.mxu0 %v2468_v0  ;;  %v3048_v59 = vor.u32 %v3626_v57, %v3047_v56  ;;  %v3615_v61 = vld [vmem:[%s5478_s5 + $0x54] sm:$0xf]  ;;  %v3668_v57 = vld [vmem:[%s5478_s5 + $0x1f4] sm:$0xf0] }
  0xe7   :  { %1273 = vmatpush.bf16.msra.mxu1 %v2596_v1  ;;  %v3012_v0 = vor.u32 %v3615_v61, %v3009_v62  ;;  %v3039_v1 = vld [vmem:[%s5478_s5 + $0x90] sm:$0xf] }
  0xe8   :  { %v3040_v3 = vor.u32 %v3624_v2, %v3039_v1  ;;  %v3153_v1 = vld [vmem:[%s5478_s5 + $0x178] sm:$0xf0] }
  0xe9   :  { %1285 = vmatpush.bf16.msra.mxu2 %v2740_v7  ;;  %1261 = vmatmul.bf16.vlgmr.msra.gmra.mxu0 %v4391_v50  ;;  %v3000_v50 = vor.u32 %v3614_v26, %v2999_v25  ;;  %v3644_v25 = vld [vmem:[%s5478_s5 + $0x134] sm:$0xf0]  ;;  %v3609_v26 = vld [vmem:[%s5478_s5 + $0x24] sm:$0xf] }
  0xea   :  { %1710 = vmatpush.bf16.msrb.mxu0 %v3024_v4  ;;  %1298 = vmatpush.bf16.msra.mxu3 %v2868_v11  ;;  %v3135_v4 = vld [vmem:[%s5478_s5 + $0x150] sm:$0xf]  ;;  %v3622_v11 = vld [vmem:[%s5478_s5 + $0x84] sm:$0xf0] }
  0xeb   :  { %1723 = vmatpush.bf16.msrb.mxu1 %v3088_v6  ;;  %v3613_v6 = vld [vmem:[%s5478_s5 + $0x44] sm:$0xf]  ;;  %v3136_v7 = vor.u32 %v3648_v5, %v3135_v4  ;;  %v3032_v13 = vor.u32 %v3622_v11, %v3031_v10  ;;  %v3207_v4 = vld [vmem:[%s5478_s5 + $0x1e0] sm:$0xf]  ;;  %v3666_v5 = vld [vmem:[%s5478_s5 + $0x1e4] sm:$0xf0] }
  0xec   :  { %1274 = vmatmul.bf16.vlgmr.msra.gmra.mxu1 %v4399_v55  ;;  %v2991_v55 = vld [vmem:[%s5478_s5 + $0x30] sm:$0xf]  ;;  %v3004_v9 = vor.u32 %v3613_v6, %v3001_v8  ;;  %v3625_v6 = vld [vmem:[%s5478_s5 + $0xa4] sm:$0xf]  ;;  %v3049_v8 = vld [vmem:[%s5478_s5 + $0xa8] sm:$0xf0] }
  0xed   :  { %1286 = vmatpush.bf16.msra.mxu2 %v2724_v19  ;;  %v2992_v28 = vor.u32 %v3612_v27, %v2991_v55  ;;  %v2985_v55 = vld [vmem:[%s5478_s5 + $0x28] sm:$0xf0]  ;;  %v3633_v27 = vld [vmem:[%s5478_s5 + $0xe4] sm:$0xf] }
  0xee   :  { %1711 = vmatpush.bf16.msrb.mxu0 %v3016_v17  ;;  %1299 = vmatpush.bf16.msra.mxu3 %v2852_v23  ;;  %v2993_v17 = vld [vmem:[%s5478_s5 + $0x38] sm:$0xf0]  ;;  %v3092_v23 = vor.u32 %v3635_v20, %v3089_v22  ;;  %v3145_v10 = vld [vmem:[%s5478_s5 + $0x168] sm:$0xf0]  ;;  %v3623_v22 = vld [vmem:[%s5478_s5 + $0x94] sm:$0xf] }
  0xef   :  { %1724 = vmatpush.bf16.msrb.mxu1 %v3080_v18  ;;  %v3128_v18 = vor.u32 %v3646_v15, %v3127_v12  ;;  %v2996_v19 = vor.u32 %v3611_v16, %v2993_v17  ;;  %v3052_v12 = vor.u32 %v3625_v6, %v3049_v8  ;;  %v3159_v8 = vld [vmem:[%s5478_s5 + $0x180] sm:$0xf] }
  0xf0   :  { %1287 = vmatmul.bf16.vlgmr.msra.gmra.mxu2 %v4433_v14  ;;  %v3610_v14 = vld [vmem:[%s5478_s5 + $0x24] sm:$0xf0] }
  0xf1   :  { %1300 = vmatmul.bf16.vlgmr.msra.gmra.mxu3 %v4444_v21  ;;  %v2984_v21 = vor.u32 %v3610_v14, %v2983_v29  ;;  %1736 = vmatpush.bf16.msrb.mxu2 %v3152_v53  ;;  %v2988_v29 = vor.u32 %v3609_v26, %v2985_v55  ;;  %v3638_v53 = vld [vmem:[%s5478_s5 + $0x104] sm:$0xf0]  ;;  %v3137_v55 = vld [vmem:[%s5478_s5 + $0x158] sm:$0xf0] }
  0xf2   :  { %1712 = vmatpush.bf16.msrb.mxu0 %v3008_v24  ;;  %v3119_v24 = vld [vmem:[%s5478_s5 + $0x130] sm:$0xf]  ;;  %v3096_v56 = vor.u32 %v3638_v53, %v3095_v52  ;;  %v3175_v52 = vld [vmem:[%s5478_s5 + $0x1a0] sm:$0xf]  ;;  %v3658_v53 = vld [vmem:[%s5478_s5 + $0x1a4] sm:$0xf0] }
  0xf3   :  { %1725 = vmatpush.bf16.msrb.mxu1 %v3072_v37  ;;  %v3073_v37 = vld [vmem:[%s5478_s5 + $0xd8] sm:$0xf0] }
  0xf4   :  { %v3076_v40 = vor.u32 %v3631_v34, %v3073_v37  ;;  %v3129_v37 = vld [vmem:[%s5478_s5 + $0x148] sm:$0xf0] }
  0xf5   :  { %1737 = vmatpush.bf16.msrb.mxu2 %v3144_v63 }
  0xf6   :  { %1713 = vmatpush.bf16.msrb.mxu0 %v3000_v50  ;;  %v3120_v50 = vor.u32 %v3644_v25, %v3119_v24  ;;  %v3647_v24 = vld [vmem:[%s5478_s5 + $0x154] sm:$0xf] }
  0xf7   :  { %1726 = vmatpush.bf16.msrb.mxu1 %v3064_v43 }
  0xf9   :  { %1738 = vmatpush.bf16.msrb.mxu2 %v3136_v7  ;;  %v3208_v7 = vor.u32 %v3666_v5, %v3207_v4  ;;  %v3105_v4 = vld [vmem:[%s5478_s5 + $0x118] sm:$0xf0] }
  0xfa   :  { %1714 = vmatpush.bf16.msrb.mxu0 %v2992_v28  ;;  %v3081_v28 = vld [vmem:[%s5478_s5 + $0xe8] sm:$0xf0] }
  0xfb   :  { %1727 = vmatpush.bf16.msrb.mxu1 %v3056_v48  ;;  %v3084_v14 = vor.u32 %v3633_v27, %v3081_v28  ;;  %v3140_v28 = vor.u32 %v3647_v24, %v3137_v55 }
  0xfd   :  { %1739 = vmatpush.bf16.msrb.mxu2 %v3128_v18  ;;  %v3199_v18 = vld [vmem:[%s5478_s5 + $0x1d0] sm:$0xf] }
  0xfe   :  { %1715 = vmatpush.bf16.msrb.mxu0 %v2984_v21  ;;  %v3111_v21 = vld [vmem:[%s5478_s5 + $0x120] sm:$0xf] }
  0xff   :  { %1728 = vmatpush.bf16.msrb.mxu1 %v3048_v59  ;;  %v3112_v31 = vor.u32 %v3642_v30, %v3111_v21  ;;  %v3057_v59 = vld [vmem:[%s5478_s5 + $0xb8] sm:$0xf0]  ;;  %v3662_v21 = vld [vmem:[%s5478_s5 + $0x1c4] sm:$0xf0]  ;;  %v3621_v30 = vld [vmem:[%s5478_s5 + $0x84] sm:$0xf] }
 0x100   :  { %v3060_v63 = vor.u32 %v3627_v58, %v3057_v59  ;;  %v3176_v58 = vor.u32 %v3658_v53, %v3175_v52  ;;  %v3655_v52 = vld [vmem:[%s5478_s5 + $0x194] sm:$0xf]  ;;  %v3169_v53 = vld [vmem:[%s5478_s5 + $0x198] sm:$0xf0] }
 0x101   :  { %1740 = vmatpush.bf16.msrb.mxu2 %v3120_v50 }
 0x102   :  { %1716 = vmatpush.bf16.msrb.mxu0 %v2976_v33  ;;  %v2977_v33 = vld [vmem:[%s5478_s5 + $0x18] sm:$0xf0] }
 0x103   :  { %1729 = vmatpush.bf16.msrb.mxu1 %v3040_v3  ;;  %v2980_v36 = vor.u32 %v3607_v32, %v2977_v33  ;;  %v450_v33 = vperm.slane %v4982_v38, 1 }
 0x105   :  { %1741 = vmatpush.bf16.msrb.mxu2 %v3112_v31  ;;  %v3033_v31 = vld [vmem:[%s5478_s5 + $0x88] sm:$0xf0] }
 0x106   :  { %1717 = vmatpush.bf16.msrb.mxu0 %v2968_v41  ;;  %v3103_v41 = vld [vmem:[%s5478_s5 + $0x110] sm:$0xf] }
 0x107   :  { %1730 = vmatpush.bf16.msrb.mxu1 %v3032_v13  ;;  %v3104_v43 = vor.u32 %v3640_v42, %v3103_v41 }
 0x109   :  { %1742 = vmatpush.bf16.msrb.mxu2 %v3104_v43  ;;  %v3183_v43 = vld [vmem:[%s5478_s5 + $0x1b0] sm:$0xf] }
 0x10a   :  { %1762 = vmatpush.bf16.msra.mxu0 %v3028_v44  ;;  %v3605_v44 = vld [vmem:[%s5478_s5 + $0x4] sm:$0xf] }
 0x10b   :  { %1775 = vmatpush.bf16.msra.mxu1 %v3092_v23  ;;  %v2972_v48 = vor.u32 %v3605_v44, %v2969_v45  ;;  %v3041_v23 = vld [vmem:[%s5478_s5 + $0x98] sm:$0xf0]  ;;  %v3660_v44 = vld [vmem:[%s5478_s5 + $0x1b4] sm:$0xf0] }
 0x10c   :  { %v3044_v50 = vor.u32 %v3623_v22, %v3041_v23  ;;  %v3184_v45 = vor.u32 %v3660_v44, %v3183_v43  ;;  %v451_v23 = vperm.slane %v4982_v38, 2 }
 0x10d   :  { %1743 = vmatpush.bf16.msrb.mxu2 %v3096_v56  ;;  %v3641_v56 = vld [vmem:[%s5478_s5 + $0x124] sm:$0xf] }
 0x10e   :  { %1763 = vmatpush.bf16.msra.mxu0 %v3020_v54  ;;  %v3215_v54 = vld [vmem:[%s5478_s5 + $0x1f0] sm:$0xf] }
 0x10f   :  { %1776 = vmatpush.bf16.msra.mxu1 %v3084_v14  ;;  %v3216_v62 = vor.u32 %v3668_v57, %v3215_v54  ;;  %v3191_v14 = vld [vmem:[%s5478_s5 + $0x1c0] sm:$0xf]  ;;  %v3113_v57 = vld [vmem:[%s5478_s5 + $0x128] sm:$0xf0] }
 0x110   :  { %v3192_v34 = vor.u32 %v3662_v21, %v3191_v14  ;;  %v3663_v14 = vld [vmem:[%s5478_s5 + $0x1d4] sm:$0xf]  ;;  %v3201_v21 = vld [vmem:[%s5478_s5 + $0x1d8] sm:$0xf0] }
 0x111   :  { %1749 = vmatpush.bf16.msrb.mxu3 %v3216_v62 }
 0x112   :  { %1764 = vmatpush.bf16.msra.mxu0 %v3012_v0  ;;  %v3651_v0 = vld [vmem:[%s5478_s5 + $0x174] sm:$0xf] }
 0x113   :  { %1777 = vmatpush.bf16.msra.mxu1 %v3076_v40  ;;  %v3156_v3 = vor.u32 %v3651_v0, %v3153_v1  ;;  %v3167_v0 = vld [vmem:[%s5478_s5 + $0x190] sm:$0xf]  ;;  %v3656_v1 = vld [vmem:[%s5478_s5 + $0x194] sm:$0xf0] }
 0x115   :  { %1788 = vmatpush.bf16.msra.mxu2 %v3156_v3  ;;  %1750 = vmatpush.bf16.msrb.mxu3 %v3208_v7  ;;  %v3639_v3 = vld [vmem:[%s5478_s5 + $0x114] sm:$0xf] }
 0x116   :  { %1765 = vmatpush.bf16.msra.mxu0 %v3004_v9  ;;  %v3649_v9 = vld [vmem:[%s5478_s5 + $0x164] sm:$0xf]  ;;  %v3108_v6 = vor.u32 %v3639_v3, %v3105_v4 }
 0x117   :  { %1778 = vmatpush.bf16.msra.mxu1 %v3068_v51  ;;  %v3148_v13 = vor.u32 %v3649_v9, %v3145_v10  ;;  %v3654_v9 = vld [vmem:[%s5478_s5 + $0x184] sm:$0xf0]  ;;  %v3637_v10 = vld [vmem:[%s5478_s5 + $0x104] sm:$0xf] }
 0x119   :  { %1789 = vmatpush.bf16.msra.mxu2 %v3148_v13  ;;  %v3160_v13 = vor.u32 %v3654_v9, %v3159_v8 }
 0x11a   :  { %1766 = vmatpush.bf16.msra.mxu0 %v2996_v19  ;;  %v3664_v19 = vld [vmem:[%s5478_s5 + $0x1d4] sm:$0xf0] }
 0x11b   :  { %1779 = vmatpush.bf16.msra.mxu1 %v3060_v63  ;;  %v3200_v20 = vor.u32 %v3664_v19, %v3199_v18 }
 0x11d   :  { %1751 = vmatpush.bf16.msrb.mxu3 %v3200_v20  ;;  %1790 = vmatpush.bf16.msra.mxu2 %v3140_v28 }
 0x11e   :  { %1767 = vmatpush.bf16.msra.mxu0 %v2988_v29 }
 0x11f   :  { %1780 = vmatpush.bf16.msra.mxu1 %v3052_v12 }
 0x121   :  { %1752 = vmatpush.bf16.msrb.mxu3 %v3192_v34 }
 0x122   :  { %1768 = vmatpush.bf16.msra.mxu0 %v2980_v36  ;;  %v3645_v36 = vld [vmem:[%s5478_s5 + $0x144] sm:$0xf] }
 0x123   :  { %1781 = vmatpush.bf16.msra.mxu1 %v3044_v50  ;;  %v3132_v41 = vor.u32 %v3645_v36, %v3129_v37  ;;  %v3209_v50 = vld [vmem:[%s5478_s5 + $0x1e8] sm:$0xf0] }
 0x124   :  { %v3193_v36 = vld [vmem:[%s5478_s5 + $0x1c8] sm:$0xf0] }
 0x125   :  { %v1106_v35 = vpop.f32.mrf.mxu0  ;;  %1791 = vmatpush.bf16.msra.mxu2 %v3132_v41  ;;  %1753 = vmatpush.bf16.msrb.mxu3 %v3184_v45  ;;  %v3659_v41 = vld [vmem:[%s5478_s5 + $0x1b4] sm:$0xf]  ;;  %v3657_v45 = vld [vmem:[%s5478_s5 + $0x1a4] sm:$0xf] }
 0x126   :  { %v1119_v39 = vpop.f32.mrf.mxu1  ;;  %1769 = vmatpush.bf16.msra.mxu0 %v2972_v48  ;;  %v1107_v60 = vadd.f32 %v1106_v35, %v449_v47  ;;  %v3036_v35 = vor.u32 %v3621_v30, %v3033_v31  ;;  %v3121_v47 = vld [vmem:[%s5478_s5 + $0x138] sm:$0xf0]  ;;  %v3204_v30 = vor.u32 %v3663_v14, %v3201_v21 }
 0x127   :  { %v3124_v51 = vor.u32 %v3643_v46, %v3121_v47  ;;  %v3177_v46 = vld [vmem:[%s5478_s5 + $0x1a8] sm:$0xf0] }
 0x128   :  { %v1120_v11 = vadd.f32 %v1119_v39, %v1107_v60  ;;  %1782 = vmatpush.bf16.msra.mxu1 %v3036_v35  ;;  %v3116_v60 = vor.u32 %v3641_v56, %v3113_v57  ;;  %v3661_v35 = vld [vmem:[%s5478_s5 + $0x1c4] sm:$0xf]  ;;  %v3161_v57 = vld [vmem:[%s5478_s5 + $0x188] sm:$0xf0] }
 0x129   :  { %1792 = vmatpush.bf16.msra.mxu2 %v3124_v51  ;;  %1754 = vmatpush.bf16.msrb.mxu3 %v3176_v58  ;;  %v3196_v37 = vor.u32 %v3661_v35, %v3193_v36  ;;  %v3180_v51 = vor.u32 %v3657_v45, %v3177_v46  ;;  %v3653_v56 = vld [vmem:[%s5478_s5 + $0x184] sm:$0xf]  ;;  %v3249_v45 = vld [vmem:[%s5480_s7 + $0x38] sm:$0xf0] }
 0x12d   :  { %v1108_v61 = vpop.f32.mrf.mxu0  ;;  %1793 = vmatpush.bf16.msra.mxu2 %v3116_v60  ;;  %v3164_v60 = vor.u32 %v3653_v56, %v3161_v57  ;;  %v3698_v57 = vld [vmem:[%s5480_s7 + $0xe4] sm:$0xf0] }
 0x12e   :  { %v1121_v2 = vpop.f32.mrf.mxu1 }
 0x12f   :  { %v3168_v2 = vor.u32 %v3656_v1, %v3167_v0 }
 0x131   :  { %1755 = vmatpush.bf16.msrb.mxu3 %v3168_v2  ;;  %1794 = vmatpush.bf16.msra.mxu2 %v3108_v6 }
 0x133   :  { %v1132_v15 = vpop.f32.mrf.mxu2 }
 0x134   :  { %v1133_v16 = vadd.f32 %v1132_v15, %v1120_v11  ;;  %v1145_v17 = vpop.f32.mrf.mxu3  ;;  %v3097_v15 = vld [vmem:[%s5478_s5 + $0x108] sm:$0xf0] }
 0x135   :  { %v1158_v26 = vpop.f32.mrf.mxu0  ;;  %v3100_v19 = vor.u32 %v3637_v10, %v3097_v15  ;;  %1756 = vmatpush.bf16.msrb.mxu3 %v3160_v13  ;;  %v3684_v13 = vld [vmem:[%s5480_s7 + $0x74] sm:$0xf0]  ;;  %v3683_v15 = vld [vmem:[%s5480_s7 + $0x74] sm:$0xf] }
 0x136   :  { %v1146_v25 = vadd.f32 %v1145_v17, %v1133_v16  ;;  %v1171_v27 = vpop.f32.mrf.mxu1  ;;  %v1159_v48 = vadd.f32 %v1158_v26, %v450_v33  ;;  %v3667_v16 = vld [vmem:[%s5478_s5 + $0x1f4] sm:$0xf]  ;;  %v3217_v17 = vld [vmem:[%s5478_s5 + $0x1f8] sm:$0xf0]  ;;  %v3665_v26 = vld [vmem:[%s5478_s5 + $0x1e4] sm:$0xf] }
 0x137   :  { %v3220_v20 = vor.u32 %v3667_v16, %v3217_v17  ;;  %1795 = vmatpush.bf16.msra.mxu2 %v3100_v19  ;;  %v3212_v55 = vor.u32 %v3665_v26, %v3209_v50  ;;  %v3281_v17 = vld [vmem:[%s5480_s7 + $0x78] sm:$0xf0]  ;;  %v3271_v19 = vld [vmem:[%s5480_s7 + $0x60] sm:$0xf]  ;;  %v3680_v26 = vld [vmem:[%s5480_s7 + $0x54] sm:$0xf0] }
 0x138   :  { %vm1305_vm4 = vcmp.gt.f32.partialorder %v1146_v25, 0.0  ;;  %v1309_v29 = vmul.f32 0.01, %v1146_v25  ;;  %v1172_v59 = vadd.f32 %v1171_v27, %v1159_v48 }
 0x139   :  { %1801 = vmatpush.bf16.msra.mxu3 %v3220_v20  ;;  %v3682_v20 = vld [vmem:[%s5480_s7 + $0x64] sm:$0xf0] }
 0x13a   :  { %v1313_v32 = vsel %vm1305_vm4, %v1146_v25, %v1309_v29 }
 0x13b   :  { %v1317_v39 = vpack.c.bf16 %v1313_v32, %v1313_v32  ;;  %v1134_v40 = vpop.f32.mrf.mxu2 }
 0x13c   :  { %v1147_v42 = vpop.f32.mrf.mxu3 }
 0x13d   :  { %1718 = vmatmul.bf16.vlgmr.msrb.gmra.mxu0 %v1317_v39  ;;  %v1160_v49 = vpop.f32.mrf.mxu0  ;;  %1802 = vmatpush.bf16.msra.mxu3 %v3212_v55  ;;  %v3185_v42 = vld [vmem:[%s5478_s5 + $0x1b8] sm:$0xf0] }
 0x13e   :  { %v1173_v54 = vpop.f32.mrf.mxu1  ;;  %v3188_v44 = vor.u32 %v3659_v41, %v3185_v42  ;;  %v3343_v41 = vld [vmem:[%s5480_s7 + $0xf0] sm:$0xf] }
 0x13f   :  { %v3172_v54 = vor.u32 %v3655_v52, %v3169_v53  ;;  %v3239_v52 = vld [vmem:[%s5480_s7 + $0x20] sm:$0xf]  ;;  %v3674_v53 = vld [vmem:[%s5480_s7 + $0x24] sm:$0xf0] }
 0x140   :  { %v3240_v56 = vor.u32 %v3674_v53, %v3239_v52  ;;  %v46_v52 = vld [vmem:[%s5481_s6] sm:$0x3] }
 0x141   :  { %1803 = vmatpush.bf16.msra.mxu3 %v3204_v30  ;;  %v3255_v30 = vld [vmem:[%s5480_s7 + $0x40] sm:$0xf] }
 0x143   :  { %v1184_v61 = vpop.f32.mrf.mxu2 }
 0x144   :  { %v1185_v62 = vadd.f32 %v1184_v61, %v1172_v59  ;;  %v1197_v63 = vpop.f32.mrf.mxu3  ;;  %v452_v61 = vperm.slane %v4982_v38, 3 }
 0x145   :  { %1804 = vmatpush.bf16.msra.mxu3 %v3196_v37 }
 0x146   :  { %v1198_v5 = vadd.f32 %v1197_v63, %v1185_v62  ;;  %v1210_v7 = vpop.f32.mrf.mxu0 }
 0x147   :  { %v1211_v27 = vadd.f32 %v1210_v7, %v451_v23  ;;  %v3272_v23 = vor.u32 %v3682_v20, %v3271_v19  ;;  %v3694_v20 = vld [vmem:[%s5480_s7 + $0xc4] sm:$0xf0] }
 0x148   :  { %vm1306_vm5 = vcmp.gt.f32.partialorder %v1198_v5, 0.0  ;;  %v1310_v11 = vmul.f32 0.01, %v1198_v5 }
 0x149   :  { %v1223_v12 = vpop.f32.mrf.mxu1  ;;  %1805 = vmatpush.bf16.msra.mxu3 %v3188_v44  ;;  %v3675_v44 = vld [vmem:[%s5480_s7 + $0x34] sm:$0xf] }
 0x14a   :  { %v1314_v18 = vsel %vm1306_vm5, %v1198_v5, %v1310_v11  ;;  %v1224_v31 = vadd.f32 %v1223_v12, %v1211_v27  ;;  %v3279_v12 = vld [vmem:[%s5480_s7 + $0x70] sm:$0xf] }
 0x14b   :  { %v1318_v22 = vpack.c.bf16 %v1314_v18, %v1314_v18  ;;  %v1186_v24 = vpop.f32.mrf.mxu2  ;;  %v3280_v16 = vor.u32 %v3684_v13, %v3279_v12  ;;  %v3284_v18 = vor.u32 %v3683_v15, %v3281_v17  ;;  %v3329_v12 = vld [vmem:[%s5480_s7 + $0xd8] sm:$0xf0]  ;;  %v3223_v15 = vld [vmem:[%s5480_s7] sm:$0xf] }
 0x14c   :  { %v1199_v25 = vpop.f32.mrf.mxu3  ;;  %v3273_v24 = vld [vmem:[%s5480_s7 + $0x68] sm:$0xf0]  ;;  %v3319_v17 = vld [vmem:[%s5480_s7 + $0xc0] sm:$0xf] }
 0x14d   :  { %1731 = vmatmul.bf16.vlgmr.msrb.gmra.mxu1 %v1318_v22  ;;  %1770 = vmatmul.bf16.vlgmr.msra.gmra.mxu0 %v1317_v39  ;;  %v3263_v25 = vld [vmem:[%s5480_s7 + $0x50] sm:$0xf] }
 0x14e   :  { %v1212_v28 = vpop.f32.mrf.mxu0  ;;  %1806 = vmatpush.bf16.msra.mxu3 %v3180_v51  ;;  %2019 = vmatpush.bf16.msrb.mxu0 %v3280_v16  ;;  %v3264_v14 = vor.u32 %v3680_v26, %v3263_v25  ;;  %v3670_v16 = vld [vmem:[%s5480_s7 + $0x4] sm:$0xf0]  ;;  %v3320_v25 = vor.u32 %v3694_v20, %v3319_v17  ;;  %v3704_v20 = vld [vmem:[%s5482_s9 + $0x18] sm:$0xff] }
 0x14f   :  { %v3679_v28 = vld [vmem:[%s5480_s7 + $0x54] sm:$0xf]  ;;  %v3224_v19 = vor.u32 %v3670_v16, %v3223_v15 }
 0x151   :  { %v1225_v29 = vpop.f32.mrf.mxu1 }
 0x152   :  { %1807 = vmatpush.bf16.msra.mxu3 %v3172_v54  ;;  %v3265_v29 = vld [vmem:[%s5480_s7 + $0x58] sm:$0xf0]  ;;  %2020 = vmatpush.bf16.msrb.mxu0 %v3272_v23  ;;  %v3335_v54 = vld [vmem:[%s5480_s7 + $0xe0] sm:$0xf]  ;;  %v3225_v23 = vld [vmem:[%s5480_s7 + $0x8] sm:$0xf0] }
 0x153   :  { %v1236_v32 = vpop.f32.mrf.mxu2  ;;  %v3268_v21 = vor.u32 %v3679_v28, %v3265_v29  ;;  %v3321_v28 = vld [vmem:[%s5480_s7 + $0xc8] sm:$0xf0] }
 0x154   :  { %v1249_v33 = vpop.f32.mrf.mxu3  ;;  %v1237_v34 = vadd.f32 %v1236_v32, %v1224_v31  ;;  %v3678_v31 = vld [vmem:[%s5480_s7 + $0x44] sm:$0xf0]  ;;  %v3677_v32 = vld [vmem:[%s5480_s7 + $0x44] sm:$0xf] }
 0x156   :  { %v1250_v39 = vadd.f32 %v1249_v33, %v1237_v34  ;;  %1808 = vmatpush.bf16.msra.mxu3 %v3164_v60  ;;  %2021 = vmatpush.bf16.msrb.mxu0 %v3264_v14  ;;  %v3256_v33 = vor.u32 %v3678_v31, %v3255_v30  ;;  %v3257_v34 = vld [vmem:[%s5480_s7 + $0x48] sm:$0xf0]  ;;  %v3311_v14 = vld [vmem:[%s5480_s7 + $0xb0] sm:$0xf]  ;;  %v3691_v30 = vld [vmem:[%s5480_s7 + $0xb4] sm:$0xf] }
 0x157   :  { %v3260_v37 = vor.u32 %v3677_v32, %v3257_v34  ;;  %v3313_v32 = vld [vmem:[%s5480_s7 + $0xb8] sm:$0xf0]  ;;  %v3690_v34 = vld [vmem:[%s5480_s7 + $0xa4] sm:$0xf0] }
 0x158   :  { %vm1307_vm6 = vcmp.gt.f32.partialorder %v1250_v39, 0.0  ;;  %v1311_v40 = vmul.f32 0.01, %v1250_v39 }
 0x15a   :  { %v1315_v43 = vsel %vm1307_vm6, %v1250_v39, %v1311_v40  ;;  %v3247_v39 = vld [vmem:[%s5480_s7 + $0x30] sm:$0xf]  ;;  %v3676_v40 = vld [vmem:[%s5480_s7 + $0x34] sm:$0xf0]  ;;  %2022 = vmatpush.bf16.msrb.mxu0 %v3256_v33  ;;  %v3303_v33 = vld [vmem:[%s5480_s7 + $0xa0] sm:$0xf] }
 0x15b   :  { %v1319_v47 = vpack.c.bf16 %v1315_v43, %v1315_v43  ;;  %v1238_v48 = vpop.f32.mrf.mxu2  ;;  %v3248_v42 = vor.u32 %v3676_v40, %v3247_v39  ;;  %v3700_v43 = vld [vmem:[%s5480_s7 + $0xf4] sm:$0xf0]  ;;  %v3304_v39 = vor.u32 %v3690_v34, %v3303_v33  ;;  %v47_v33 = vld [vmem:[%s5485_s8] sm:$0x3] }
 0x15c   :  { %v1251_v49 = vpop.f32.mrf.mxu3  ;;  %v3344_v46 = vor.u32 %v3700_v43, %v3343_v41  ;;  %v3699_v48 = vld [vmem:[%s5480_s7 + $0xf4] sm:$0xf]  ;;  %v3688_v43 = vld [vmem:[%s5480_s7 + $0x94] sm:$0xf0] }
 0x15d   :  { %1783 = vmatmul.bf16.vlgmr.msra.gmra.mxu1 %v1318_v22  ;;  %1744 = vmatmul.bf16.vlgmr.msrb.gmra.mxu2 %v1319_v47  ;;  %v3681_v22 = vld [vmem:[%s5480_s7 + $0x64] sm:$0xf]  ;;  %v3345_v49 = vld [vmem:[%s5480_s7 + $0xf8] sm:$0xf0] }
 0x15e   :  { %2045 = vmatpush.bf16.msrb.mxu2 %v3284_v18  ;;  %v3276_v27 = vor.u32 %v3681_v22, %v3273_v24  ;;  %v3348_v51 = vor.u32 %v3699_v48, %v3345_v49  ;;  %2032 = vmatpush.bf16.msrb.mxu1 %v3344_v46  ;;  %v3669_v22 = vld [vmem:[%s5480_s7 + $0x4] sm:$0xf]  ;;  %v3297_v46 = vld [vmem:[%s5480_s7 + $0x98] sm:$0xf0]  ;;  %v3287_v48 = vld [vmem:[%s5480_s7 + $0x80] sm:$0xf] }
 0x15f   :  { %2023 = vmatpush.bf16.msrb.mxu0 %v3248_v42  ;;  %v3228_v26 = vor.u32 %v3669_v22, %v3225_v23  ;;  %v3295_v42 = vld [vmem:[%s5480_s7 + $0x90] sm:$0xf]  ;;  %v3686_v49 = vld [vmem:[%s5480_s7 + $0x84] sm:$0xf0]  ;;  %v3713_v22 = vld [vmem:[%s5482_s9 + $0x60] sm:$0xff] }
 0x160   :  { %v3703_v23 = vld [vmem:[%s5482_s9 + $0x10] sm:$0xff] }
 0x162   :  { %2046 = vmatpush.bf16.msrb.mxu2 %v3276_v27  ;;  %v3693_v27 = vld [vmem:[%s5480_s7 + $0xc4] sm:$0xf] }
 0x163   :  { %2024 = vmatpush.bf16.msrb.mxu0 %v3240_v56  ;;  %v3324_v29 = vor.u32 %v3693_v27, %v3321_v28  ;;  %v3289_v56 = vld [vmem:[%s5480_s7 + $0x88] sm:$0xf0]  ;;  %v3701_v27 = vld [vmem:[%s5482_s9] sm:$0xff] }
 0x164   :  { %v3710_v28 = vld [vmem:[%s5482_s9 + $0x48] sm:$0xff] }
 0x166   :  { %v1262_v58 = vpop.f32.mrf.mxu0  ;;  %2047 = vmatpush.bf16.msrb.mxu2 %v3268_v21  ;;  %v3692_v21 = vld [vmem:[%s5480_s7 + $0xb4] sm:$0xf0] }
 0x167   :  { %v1263_v62 = vadd.f32 %v1262_v58, %v452_v61  ;;  %v3673_v58 = vld [vmem:[%s5480_s7 + $0x24] sm:$0xf]  ;;  %v3336_v61 = vor.u32 %v3698_v57, %v3335_v54  ;;  %v3312_v31 = vor.u32 %v3692_v21, %v3311_v14  ;;  %v3288_v54 = vor.u32 %v3686_v49, %v3287_v48  ;;  %v3724_v14 = vld [vmem:[%s5484_s11 + $0x38] sm:$0xff] }
 0x169   :  { %v1275_v59 = vpop.f32.mrf.mxu1  ;;  %2033 = vmatpush.bf16.msrb.mxu1 %v3336_v61  ;;  %v3716_v61 = vld [vmem:[%s5482_s9 + $0x78] sm:$0xff] }
 0x16a   :  { %v1276_v1 = vadd.f32 %v1275_v59, %v1263_v62  ;;  %2048 = vmatpush.bf16.msrb.mxu2 %v3260_v37  ;;  %v3241_v59 = vld [vmem:[%s5480_s7 + $0x28] sm:$0xf0] }
 0x16b   :  { %v3244_v62 = vor.u32 %v3673_v58, %v3241_v59  ;;  %v3305_v37 = vld [vmem:[%s5480_s7 + $0xa8] sm:$0xf0]  ;;  %v1386_v58 = vperm.slane %v46_v52, 0  ;;  %v3708_v59 = vld [vmem:[%s5482_s9 + $0x38] sm:$0xff] }
 0x16d   :  { %1796 = vmatmul.bf16.vlgmr.msra.gmra.mxu2 %v1319_v47  ;;  %v3252_v47 = vor.u32 %v3675_v44, %v3249_v45  ;;  %v3687_v44 = vld [vmem:[%s5480_s7 + $0x94] sm:$0xf]  ;;  %v3296_v45 = vor.u32 %v3688_v43, %v3295_v42  ;;  %v1856_v42 = vperm.slane %v47_v33, 1 }
 0x16e   :  { %v1264_v63 = vpop.f32.mrf.mxu0 }
 0x16f   :  { %2049 = vmatpush.bf16.msrb.mxu2 %v3252_v47  ;;  %v3697_v63 = vld [vmem:[%s5480_s7 + $0xe4] sm:$0xf]  ;;  %v3300_v47 = vor.u32 %v3687_v44, %v3297_v46 }
 0x171   :  { %v1277_v0 = vpop.f32.mrf.mxu1 }
 0x172   :  { %v3337_v0 = vld [vmem:[%s5480_s7 + $0xe8] sm:$0xf0] }
 0x173   :  { %v1288_v2 = vpop.f32.mrf.mxu2  ;;  %2050 = vmatpush.bf16.msrb.mxu2 %v3244_v62  ;;  %v3707_v62 = vld [vmem:[%s5482_s9 + $0x30] sm:$0xff] }
 0x174   :  { %v1289_v3 = vadd.f32 %v1288_v2, %v1276_v1  ;;  %v1301_v4 = vpop.f32.mrf.mxu3  ;;  %v3340_v1 = vor.u32 %v3697_v63, %v3337_v0  ;;  %v3231_v2 = vld [vmem:[%s5480_s7 + $0x10] sm:$0xf] }
 0x176   :  { %v1302_v5 = vadd.f32 %v1301_v4, %v1289_v3  ;;  %v3672_v3 = vld [vmem:[%s5480_s7 + $0x14] sm:$0xf0]  ;;  %v3327_v4 = vld [vmem:[%s5480_s7 + $0xd0] sm:$0xf] }
 0x178   :  { %vm1308_vm7 = vcmp.gt.f32.partialorder %v1302_v5, 0.0  ;;  %v1312_v6 = vmul.f32 0.01, %v1302_v5 }
 0x17a   :  { %v1316_v7 = vsel %vm1308_vm7, %v1302_v5, %v1312_v6  ;;  %v3232_v5 = vor.u32 %v3672_v3, %v3231_v2  ;;  %v3696_v6 = vld [vmem:[%s5480_s7 + $0xd4] sm:$0xf0] }
 0x17b   :  { %v1320_v8 = vpack.c.bf16 %v1316_v7, %v1316_v7  ;;  %v1290_v9 = vpop.f32.mrf.mxu2  ;;  %v3671_v7 = vld [vmem:[%s5480_s7 + $0x14] sm:$0xf] }
 0x17c   :  { %v1303_v10 = vpop.f32.mrf.mxu3  ;;  %v3328_v9 = vor.u32 %v3696_v6, %v3327_v4  ;;  %2025 = vmatpush.bf16.msrb.mxu0 %v3232_v5 }
 0x17d   :  { %1757 = vmatmul.bf16.vlgmr.msrb.gmra.mxu3 %v1320_v8 }
 0x17e   :  { %2058 = vmatpush.bf16.msrb.mxu3 %v3348_v51  ;;  %2034 = vmatpush.bf16.msrb.mxu1 %v3328_v9  ;;  %v3685_v51 = vld [vmem:[%s5480_s7 + $0x84] sm:$0xf] }
 0x17f   :  { %v3292_v57 = vor.u32 %v3685_v51, %v3289_v56 }
 0x180   :  { %2026 = vmatpush.bf16.msrb.mxu0 %v3224_v19  ;;  %v3714_v19 = vld [vmem:[%s5482_s9 + $0x68] sm:$0xff] }
 0x182   :  { %2059 = vmatpush.bf16.msrb.mxu3 %v3340_v1  ;;  %2035 = vmatpush.bf16.msrb.mxu1 %v3320_v25  ;;  %v3702_v25 = vld [vmem:[%s5482_s9 + $0x8] sm:$0xff] }
 0x184   :  { %2210 = vmatpush.bf16.msra.mxu0 %v3708_v59  ;;  %v3717_v59 = vld [vmem:[%s5484_s11] sm:$0xff] }
 0x186   :  { %2036 = vmatpush.bf16.msrb.mxu1 %v3312_v31  ;;  %v3722_v31 = vld [vmem:[%s5484_s11 + $0x28] sm:$0xff] }
 0x188   :  { %2211 = vmatpush.bf16.msra.mxu0 %v3707_v62  ;;  %v3725_v62 = vld [vmem:[%s5483_s10] ss:$0 sm:$0xff] }
 0x18a   :  { %2037 = vmatpush.bf16.msrb.mxu1 %v3304_v39 }
 0x18d   :  { %1809 = vmatmul.bf16.vlgmr.msra.gmra.mxu3 %v1320_v8  ;;  %v3233_v8 = vld [vmem:[%s5480_s7 + $0x18] sm:$0xf0] }
 0x18e   :  { %v3236_v10 = vor.u32 %v3671_v7, %v3233_v8  ;;  %2038 = vmatpush.bf16.msrb.mxu1 %v3296_v45  ;;  %v1387_v8 = vperm.slane %v46_v52, 1 }
 0x190   :  { %2051 = vmatpush.bf16.msrb.mxu2 %v3236_v10 }
 0x192   :  { %2039 = vmatpush.bf16.msrb.mxu1 %v3288_v54 }
 0x194   :  { %2052 = vmatpush.bf16.msrb.mxu2 %v3228_v26  ;;  %v3711_v26 = vld [vmem:[%s5482_s9 + $0x50] sm:$0xff] }
 0x196   :  { %2223 = vmatpush.bf16.msra.mxu1 %v3716_v61 }
 0x198   :  { %2307 = vmatpush.bf16.msra.mxu2 %v3724_v14 }
 0x1ba   :  { %v5180_v11 = vpop.f32.mrf.mxu0 }
 0x1bb   :  { %v1720_v63 = vadd.f32 %v5180_v11, %v1386_v58  ;;  %v3718_v58 = vld [vmem:[%s5484_s11 + $0x8] sm:$0xff] }
 0x1c2   :  { %v1721_v38 = vpop.f32.mrf.mxu0 }
 0x1c3   :  { %v3695_v38 = vld [vmem:[%s5480_s7 + $0xd4] sm:$0xf] }
 0x1c4   :  { %v3332_v13 = vor.u32 %v3695_v38, %v3329_v12 }
 0x1c6   :  { %2060 = vmatpush.bf16.msrb.mxu3 %v3332_v13 }
 0x1ca   :  { %v5212_v50 = vpop.f32.mrf.mxu1  ;;  %v5214_v55 = vpop.f32.mrf.mxu0  ;;  %2061 = vmatpush.bf16.msrb.mxu3 %v3324_v29  ;;  %v3709_v29 = vld [vmem:[%s5482_s9 + $0x40] sm:$0xff] }
 0x1cb   :  { %v1733_v1 = vadd.f32 %v5212_v50, %v1720_v63  ;;  %v1772_v10 = vadd.f32 %v5214_v55, %v1387_v8  ;;  %v3715_v55 = vld [vmem:[%s5482_s9 + $0x70] sm:$0xff] }
 0x1cc   :  { %2224 = vmatpush.bf16.msra.mxu1 %v3715_v55 }
 0x1d0   :  { %2225 = vmatpush.bf16.msra.mxu1 %v3714_v19 }
 0x1d2   :  { %v1734_v35 = vpop.f32.mrf.mxu1  ;;  %v1773_v36 = vpop.f32.mrf.mxu0 }
 0x1d3   :  { %v3316_v35 = vor.u32 %v3691_v30, %v3313_v32  ;;  %v3689_v36 = vld [vmem:[%s5480_s7 + $0xa4] sm:$0xf]  ;;  %v3723_v30 = vld [vmem:[%s5484_s11 + $0x30] sm:$0xff] }
 0x1d4   :  { %v3308_v41 = vor.u32 %v3689_v36, %v3305_v37  ;;  %2226 = vmatpush.bf16.msra.mxu1 %v3713_v22  ;;  %2308 = vmatpush.bf16.msra.mxu2 %v3723_v30  ;;  %v1855_v36 = vperm.slane %v47_v33, 0  ;;  %v3720_v37 = vld [vmem:[%s5484_s11 + $0x18] sm:$0xff] }
 0x1d5   :  { %2062 = vmatpush.bf16.msrb.mxu3 %v3316_v35  ;;  %v3721_v35 = vld [vmem:[%s5484_s11 + $0x20] sm:$0xff] }
 0x1d8   :  { %2309 = vmatpush.bf16.msra.mxu2 %v3722_v31 }
 0x1d9   :  { %2063 = vmatpush.bf16.msrb.mxu3 %v3308_v41 }
 0x1da   :  { %v5276_v60 = vpop.f32.mrf.mxu1 }
 0x1db   :  { %v1785_v11 = vadd.f32 %v5276_v60, %v1772_v10  ;;  %v3705_v60 = vld [vmem:[%s5482_s9 + $0x20] sm:$0xff] }
 0x1dc   :  { %2310 = vmatpush.bf16.msra.mxu2 %v3721_v35 }
 0x1dd   :  { %2064 = vmatpush.bf16.msrb.mxu3 %v3300_v47 }
 0x1e0   :  { %v5317_v18 = vpop.f32.mrf.mxu2  ;;  %2311 = vmatpush.bf16.msra.mxu2 %v3720_v37 }
 0x1e1   :  { %2065 = vmatpush.bf16.msrb.mxu3 %v3292_v57  ;;  %v1746_v2 = vadd.f32 %v5317_v18, %v1733_v1  ;;  %v3706_v18 = vld [vmem:[%s5482_s9 + $0x28] sm:$0xff]  ;;  %v3719_v57 = vld [vmem:[%s5484_s11 + $0x10] sm:$0xff] }
 0x1e2   :  { %v1786_v24 = vpop.f32.mrf.mxu1  ;;  %2212 = vmatpush.bf16.msra.mxu0 %v3706_v18 }
 0x1e3   :  { %v3712_v24 = vld [vmem:[%s5482_s9 + $0x58] sm:$0xff] }
 0x1e4   :  { %2227 = vmatpush.bf16.msra.mxu1 %v3712_v24  ;;  %2312 = vmatpush.bf16.msra.mxu2 %v3719_v57 }
 0x1e6   :  { %2213 = vmatpush.bf16.msra.mxu0 %v3705_v60 }
 0x1e8   :  { %v1747_v40 = vpop.f32.mrf.mxu2  ;;  %2228 = vmatpush.bf16.msra.mxu1 %v3711_v26  ;;  %2313 = vmatpush.bf16.msra.mxu2 %v3718_v58 }
 0x1ea   :  { %2214 = vmatpush.bf16.msra.mxu0 %v3704_v20 }
 0x1ec   :  { %2229 = vmatpush.bf16.msra.mxu1 %v3710_v28  ;;  %2314 = vmatpush.bf16.msra.mxu2 %v3717_v59 }
 0x1ee   :  { %2215 = vmatpush.bf16.msra.mxu0 %v3703_v23 }
 0x1f0   :  { %v1797_v53 = vpop.f32.mrf.mxu2  ;;  %2230 = vmatpush.bf16.msra.mxu1 %v3709_v29 }
 0x1f1   :  { %v1798_v38 = vadd.f32 %v1797_v53, %v1785_v11 }
 0x1f2   :  { %2216 = vmatpush.bf16.msra.mxu0 %v3702_v25 }
 0x1f6   :  { %2217 = vmatpush.bf16.msra.mxu0 %v3701_v27 }
 0x1f8   :  { %v1799_v0 = vpop.f32.mrf.mxu2 }
 0x200   :  { %v1758_v3 = vpop.f32.mrf.mxu3 }
 0x201   :  { %v1759_v4 = vadd.f32 %v1758_v3, %v1746_v2 }
 0x203   :  { %vm1814_vm8 = vcmp.gt.f32.partialorder %v1759_v4, 0.0  ;;  %v1816_v5 = vmul.f32 0.01, %v1759_v4 }
 0x205   :  { %v1818_v6 = vsel %vm1814_vm8, %v1759_v4, %v1816_v5 }
 0x206   :  { %v1820_v7 = vpack.c.bf16 %v1818_v6, %v1818_v6 }
 0x208   :  { %v1760_v9 = vpop.f32.mrf.mxu3  ;;  %2027 = vmatmul.bf16.vlgmr.msrb.gmra.mxu0 %v1820_v7  ;;  %2053 = vmatmul.bf16.vlgmr.msrb.gmra.mxu2 %v1820_v7  ;;  %v3726_v7 = vld [vmem:[%s5486_s12] ss:$0 sm:$0xff] }
 0x210   :  { %v1810_v12 = vpop.f32.mrf.mxu3 }
 0x211   :  { %v1811_v50 = vadd.f32 %v1810_v12, %v1798_v38 }
 0x213   :  { %vm1815_vm9 = vcmp.gt.f32.partialorder %v1811_v50, 0.0  ;;  %v1817_v13 = vmul.f32 0.01, %v1811_v50 }
 0x215   :  { %v1819_v15 = vsel %vm1815_vm9, %v1811_v50, %v1817_v13 }
 0x216   :  { %v1821_v16 = vpack.c.bf16 %v1819_v15, %v1819_v15 }
 0x218   :  { %v1812_v17 = vpop.f32.mrf.mxu3  ;;  %2040 = vmatmul.bf16.vlgmr.msrb.gmra.mxu1 %v1821_v16  ;;  %2066 = vmatmul.bf16.vlgmr.msrb.gmra.mxu3 %v1821_v16 }
 0x285   :  { %v2028_v21 = vpop.f32.mrf.mxu0 }
 0x286   :  { %v2029_v40 = vadd.f32 %v2028_v21, %v1855_v36 }
 0x28b   :  { %v2054_v32 = vpop.f32.mrf.mxu2 }
 0x28c   :  { %v2055_v45 = vadd.f32 %v2054_v32, %v1856_v42 }
 0x28d   :  { %v2030_v34 = vpop.f32.mrf.mxu0 }
 0x293   :  { %v2056_v39 = vpop.f32.mrf.mxu2 }
 0x295   :  { %v2041_v41 = vpop.f32.mrf.mxu1 }
 0x296   :  { %v2042_v43 = vadd.f32 %v2041_v41, %v2029_v40 }
 0x298   :  { %vm2071_vm10 = vcmp.gt.f32.partialorder %v2042_v43, 0.0  ;;  %v2073_v44 = vmul.f32 0.01, %v2042_v43 }
 0x29a   :  { %v2075_v46 = vsel %vm2071_vm10, %v2042_v43, %v2073_v44 }
 0x29b   :  { %v2077_v47 = vpack.c.bf16 %v2075_v46, %v2075_v46  ;;  %v2067_v48 = vpop.f32.mrf.mxu3 }
 0x29c   :  { %v2068_v49 = vadd.f32 %v2067_v48, %v2055_v45 }
 0x29d   :  { %v2043_v51 = vpop.f32.mrf.mxu1  ;;  %2218 = vmatmul.bf16.vlgmr.msra.gmra.mxu0 %v2077_v47 }
 0x29e   :  { %vm2072_vm11 = vcmp.gt.f32.partialorder %v2068_v49, 0.0  ;;  %v2074_v52 = vmul.f32 0.01, %v2068_v49 }
 0x2a0   :  { %v2076_v53 = vsel %vm2072_vm11, %v2068_v49, %v2074_v52 }
 0x2a1   :  { %v2078_v54 = vpack.c.bf16 %v2076_v53, %v2076_v53 }
 0x2a3   :  { %v2069_v56 = vpop.f32.mrf.mxu3  ;;  %2231 = vmatmul.bf16.vlgmr.msra.gmra.mxu1 %v2078_v54 }
 0x31a   :  { %v2219_v61 = vpop.f32.mrf.mxu0 }
 0x31b   :  { %v2220_v63 = vadd.f32 %v3725_v62, %v2219_v61 }
 0x320   :  { %v2232_v0 = vpop.f32.mrf.mxu1 }
 0x321   :  { %v2233_v1 = vadd.f32 %v2232_v0, %v2220_v63 }
 0x322   :  { %v2221_v2 = vpop.f32.mrf.mxu0 }
 0x323   :  { %vm2236_vm12 = vcmp.gt.f32.partialorder %v2233_v1, 0.0  ;;  %v2237_v3 = vmul.f32 0.01, %v2233_v1 }
 0x325   :  { %v2238_v4 = vsel %vm2236_vm12, %v2233_v1, %v2237_v3 }
 0x326   :  { %v2239_v5 = vpack.c.bf16 %v2238_v4, %v2238_v4 }
 0x328   :  { %v2234_v6 = vpop.f32.mrf.mxu1  ;;  %2315 = vmatmul.bf16.vlgmr.msra.gmra.mxu2 %v2239_v5 }
 0x3ab   :  { %v2316_v8 = vpop.f32.mrf.mxu2 }
 0x3ac   :  { %v2317_v9 = vadd.f32 %v3726_v7, %v2316_v8 }
 0x3ae   :  { %2320 = vst [vmem:[%s5487_s13] sm:$0xff] %v2317_v9 }
 0x3b3   :  { %v2318_v10 = vpop.f32.mrf.mxu2 }

</bundles_post_ra>
